<compile_context>
chip_gen: v6e
topology: v6e:2x2x1
jax: 0.10.0
libtpu: 0.0.40
codegen_flags: <defaults>
</compile_context>

<pallas_src>
import jax
import jax.numpy as jnp
from jax import lax
from jax.experimental import pallas as pl
from jax.experimental.pallas import tpu as pltpu
import numpy as np


def _pair(v):
    return (v, v) if isinstance(v, int) else tuple(v)


def _round_up(x, m):
    return -(-x // m) * m


def _mxu_has_int8():
    """v4/v5/v6 TPUs have a native int8 MXU path; v7x (and unknown chips) use bf16."""
    try:
        kind = jax.devices()[0].device_kind.lower()
    except Exception:
        return False
    if "v7" in kind or "7x" in kind:
        return False
    return any(tag in kind for tag in ("v4", "v5", "v6"))


def _make_qconv_kernel(use_int8, multi_k):
    """Matmul (+ K accumulation when multi_k) + fused requantize/clamp/uint8 store.

    Refs (in order): qp (SMEM f32[2] = [multiplier, zp_out]),
                     x (int8 [tm, tk]), w (int8 [tk, tn]), b (f32 [1, tn]),
                     o (uint8 [tm, tn]) [, acc scratch ([tm, tn] int32 or f32)].
    """
    def _matmul(x, w):
        if use_int8:
            # Native 8-bit MXU path (v4/v5/v6): exact int32 accumulation.
            return jnp.dot(x, w, preferred_element_type=jnp.int32)
        # v7x has no integer MXU: bf16 codes are exact for 8-bit values; f32 acc is
        # exact while |tile acc| < 2^24 (holds for tk <= 1024 worst case).
        return jnp.dot(x.astype(jnp.bfloat16), w.astype(jnp.bfloat16),
                       preferred_element_type=jnp.float32)

    def _requant(acc, qp_ref, b_ref):
        mult = qp_ref[0]
        zp_out = qp_ref[1]
        y = acc.astype(jnp.float32) * mult + b_ref[...]
        q = jnp.clip(jnp.round(y) + zp_out, 0.0, 255.0)
        return q.astype(jnp.int32).astype(jnp.uint8)

    if not multi_k:
        # Single K tile: requantize straight out of the MXU result, no scratch traffic.
        def kernel_single(qp_ref, x_ref, w_ref, b_ref, o_ref):
            o_ref[...] = _requant(_matmul(x_ref[...], w_ref[...]), qp_ref, b_ref)
        return kernel_single

    def kernel(qp_ref, x_ref, w_ref, b_ref, o_ref, acc_ref):
        k = pl.program_id(3)

        @pl.when(k == 0)
        def _init():
            acc_ref[...] = jnp.zeros_like(acc_ref)

        acc_ref[...] += _matmul(x_ref[...], w_ref[...])

        @pl.when(k == pl.num_programs(3) - 1)
        def _finalize():
            o_ref[...] = _requant(acc_ref[...], qp_ref, b_ref)

    return kernel


def _tiles_and_pads(M, K, Nout):
    """Pick (tm, tk, tn) and padded (M, K, N). 8-bit friendly, lane-dense output.

    Biggest tiles that comfortably fit VMEM (<4 MiB total incl. double buffering)."""
    tm = min(512, _round_up(M, 32))        # 8-bit sublane packing: multiples of 32
    M_pad = _round_up(M, tm)
    k128 = _round_up(K, 128)
    tk = min(1024, k128)
    K_pad = _round_up(k128, tk)
    n128 = _round_up(Nout, 128)            # lane-dense (unmasked) uint8 stores
    tn = min(512, n128)
    N_pad = _round_up(n128, tn)
    return (tm, tk, tn), (M_pad, K_pad, N_pad)


def _qconv_matmul(patches, w_mat, bias_eff, qparams, *, tm, tk, tn, use_int8):
    """patches (G, M_pad, K_pad) int8; w_mat (G, K_pad, N_pad) int8;
    bias_eff (G, 1, N_pad) f32; qparams (2,) f32 -> out (G, M_pad, N_pad) uint8."""
    G, M_pad, K_pad = patches.shape
    N_pad = w_mat.shape[2]
    k_tiles = K_pad // tk
    multi_k = k_tiles > 1
    grid = (G, M_pad // tm, N_pad // tn, k_tiles)
    acc_dtype = jnp.int32 if use_int8 else jnp.float32
    scratch = [pltpu.VMEM((tm, tn), acc_dtype)] if multi_k else []

    return pl.pallas_call(
        _make_qconv_kernel(use_int8, multi_k),
        out_shape=jax.ShapeDtypeStruct((G, M_pad, N_pad), jnp.uint8),
        grid_spec=pltpu.PrefetchScalarGridSpec(
            num_scalar_prefetch=0,
            grid=grid,
            in_specs=[
                pl.BlockSpec(memory_space=pltpu.MemorySpace.SMEM),          # qparams
                pl.BlockSpec((None, tm, tk), lambda g, m, n, k: (g, m, k)),  # patches
                pl.BlockSpec((None, tk, tn), lambda g, m, n, k: (g, k, n)),  # weights
                pl.BlockSpec((None, 1, tn), lambda g, m, n, k: (g, 0, n)),   # bias
            ],
            out_specs=pl.BlockSpec((None, tm, tn), lambda g, m, n, k: (g, m, n)),
            scratch_shapes=scratch,
        ),
        compiler_params=pltpu.CompilerParams(
            dimension_semantics=("parallel", "parallel", "parallel", "arbitrary"),
            vmem_limit_bytes=32 * 1024 * 1024,
        ),
    )(qparams, patches, w_mat, bias_eff)


def _im2col_int8(x_s8, kh, kw, sh, sw, ph, pw, dh, dw, pad_val):
    """x_s8: (N, C, H, W) int8 codes. Returns (N*OH*OW, C*kh*kw) int8, OH, OW.

    Padding uses `pad_val` (= zp_x - 128) so padded taps contribute exactly zero after
    the zero-point bias correction (i.e. real-valued zero padding, like torch)."""
    N, C, H, W = x_s8.shape
    OH = (H + 2 * ph - dh * (kh - 1) - 1) // sh + 1
    OW = (W + 2 * pw - dw * (kw - 1) - 1) // sw + 1
    xp = jnp.pad(x_s8, ((0, 0), (0, 0), (ph, ph), (pw, pw)),
                 constant_values=np.int8(pad_val))
    cols = []
    for i in range(kh):
        for j in range(kw):
            cols.append(xp[:, :,
                           i * dh: i * dh + sh * (OH - 1) + 1: sh,
                           j * dw: j * dw + sw * (OW - 1) + 1: sw])
    patches = jnp.stack(cols, axis=2)            # (N, C, kh*kw, OH, OW)
    patches = patches.transpose(0, 3, 4, 1, 2)   # (N, OH, OW, C, kh*kw)
    return patches.reshape(N * OH * OW, C * kh * kw), OH, OW


def quantized_conv2d(x_q, x_scale, x_zp, w_q, w_scale, bias,
                     stride, padding, dilation, groups, out_scale, out_zp):
    """Equivalent of torch.ops.quantized.conv2d.

    x_q: (N, C_in, H, W) uint8 quint8 codes.
    w_q: (C_out, C_in//groups, KH, KW) int8 qint8 codes (zero_point = 0).
    bias: (C_out,) float32.
    Returns (N, C_out, OH, OW) uint8 quint8 codes at (out_scale, out_zp).
    """
    stride, padding, dilation = _pair(stride), _pair(padding), _pair(dilation)
    N, C_in, H, W = x_q.shape
    C_out, Cg, kh, kw = w_q.shape
    assert C_in % groups == 0 and C_out % groups == 0 and Cg == C_in // groups
    G = groups
    Og = C_out // G
    Kg = Cg * kh * kw

    zp_x = int(x_zp)
    multiplier = float(x_scale) * float(w_scale) / float(out_scale)

    # Activation stays 8-bit: recentre uint8 codes to int8 via XOR-128 + bitcast
    # (x ^ 0x80 reinterpreted as int8 == x - 128) and fold the residual (128 - zp_x)
    # offset into a per-output-channel bias correction.
    x_s8 = lax.bitcast_convert_type(x_q ^ jnp.uint8(128), jnp.int8)
    patches, OH, OW = _im2col_int8(x_s8, kh, kw, stride[0], stride[1],
                                   padding[0], padding[1], dilation[0], dilation[1],
                                   pad_val=zp_x - 128)
    M = N * OH * OW
    # (M, C_in*kh*kw) -> (G, M, Kg)  (channel-major K ordering, matches weight reshape)
    patches = patches.reshape(M, G, Kg).transpose(1, 0, 2)

    # Weights: (C_out, Cg, kh, kw) int8 -> (G, Kg, Og) int8
    w_mat = w_q.reshape(G, Og, Kg).transpose(0, 2, 1)

    # Effective bias: bias/so + multiplier * (128 - zp_x) * sum_k(w)
    colsum = w_q.astype(jnp.int32).reshape(C_out, Kg).sum(axis=1).astype(jnp.float32)
    bias_eff = (bias.astype(jnp.float32) / float(out_scale)
                + (multiplier * float(128 - zp_x)) * colsum)         # (C_out,)
    bias_eff = bias_eff.reshape(G, 1, Og)

    (tm, tk, tn), (M_pad, K_pad, N_pad) = _tiles_and_pads(M, Kg, Og)
    patches = jnp.pad(patches, ((0, 0), (0, M_pad - M), (0, K_pad - Kg)))
    w_mat = jnp.pad(w_mat, ((0, 0), (0, K_pad - Kg), (0, N_pad - Og)))
    bias_eff = jnp.pad(bias_eff, ((0, 0), (0, 0), (0, N_pad - Og)))

    # Requantization scalars go through SMEM (not baked into the kernel binary).
    qparams = jnp.array([multiplier, float(out_zp)], dtype=jnp.float32)

    def _run(flag):
        return _qconv_matmul(patches, w_mat, bias_eff, qparams,
                             tm=tm, tk=tk, tn=tn, use_int8=flag)

    if _mxu_has_int8():
        try:
            out = _run(True)
        except Exception:
            # Safety net: fall back to the bf16 MXU path if the int8 path fails to lower.
            out = _run(False)
    else:
        out = _run(False)

    # (G, M_pad, N_pad) uint8 -> (N, C_out, OH, OW) uint8
    out = out[:, :M, :Og]                                   # (G, M, Og)
    out = out.reshape(G, N, OH, OW, Og)
    out = out.transpose(1, 0, 4, 2, 3).reshape(N, C_out, OH, OW)
    return out


class QuantizedConv2d:
    """Minimal JAX mirror of torch.nn.quantized.Conv2d (padding_mode='zeros' only)."""

    def __init__(self, in_channels, out_channels, kernel_size, stride=1, padding=0,
                 dilation=1, groups=1, bias=True, key=None,
                 weight_scale=0.02, scale=1.0, zero_point=0):
        self.in_channels = in_channels
        self.out_channels = out_channels
        self.kernel_size = _pair(kernel_size)
        self.stride = _pair(stride)
        self.padding = _pair(padding)
        self.dilation = _pair(dilation)
        self.groups = groups
        self.scale = float(scale)          # output scale
        self.zero_point = int(zero_point)  # output zero point
        self.weight_scale = float(weight_scale)

        key = jax.random.PRNGKey(0) if key is None else key
        kw_, kb_ = jax.random.split(key)
        wshape = (out_channels, in_channels // groups,
                  self.kernel_size[0], self.kernel_size[1])
        # deterministic synthetic qint8 weight codes and float bias
        self.weight_q = jax.random.randint(kw_, wshape, -64, 64,
                                           dtype=jnp.int32).astype(jnp.int8)
        self.bias = (jax.random.normal(kb_, (out_channels,), dtype=jnp.float32) * 0.1
                     if bias else jnp.zeros((out_channels,), jnp.float32))

    def __call__(self, x_q, x_scale, x_zp):
        if x_q.ndim != 4:
            raise ValueError('Input shape must be `(N, C, H, W)`!')
        return quantized_conv2d(x_q, x_scale, x_zp, self.weight_q, self.weight_scale,
                                self.bias, self.stride, self.padding, self.dilation,
                                self.groups, self.scale, self.zero_point)


if __name__ == "__main__":
    key = jax.random.PRNGKey(0)

    def run_case(name, N, C_in, C_out, H, W, ksize, stride, padding, dilation, groups,
                 x_scale, x_zp, out_scale, out_zp, case_key):
        kmod, kx = jax.random.split(case_key)
        m = QuantizedConv2d(C_in, C_out, ksize, stride=stride, padding=padding,
                            dilation=dilation, groups=groups, bias=True, key=kmod,
                            weight_scale=0.02, scale=out_scale, zero_point=out_zp)
        x_f = jax.random.normal(kx, (N, C_in, H, W), dtype=jnp.float32) * 2.0
        x_q = jnp.clip(jnp.round(x_f / x_scale) + x_zp, 0, 255).astype(jnp.uint8)

        y_q = jax.block_until_ready(m(x_q, x_scale, x_zp))
        assert y_q.dtype == jnp.uint8

        # pure-JAX reference of the same integer-conv + requantization math
        acc_ref = lax.conv_general_dilated(
            (x_q.astype(jnp.float32) - x_zp), m.weight_q.astype(jnp.float32),
            window_strides=_pair(stride), padding=[_pair(padding), _pair(padding)],
            rhs_dilation=_pair(dilation),
            dimension_numbers=('NCHW', 'OIHW', 'NCHW'),
            feature_group_count=groups)
        y_ref = acc_ref * (x_scale * m.weight_scale / out_scale) \
            + (m.bias / out_scale)[None, :, None, None]
        y_ref = jnp.clip(jnp.round(y_ref) + out_zp, 0, 255).astype(jnp.uint8)

        assert y_q.shape == y_ref.shape, f"{name}: shape {y_q.shape} vs {y_ref.shape}"
        diff = np.abs(np.asarray(y_q, np.int32) - np.asarray(y_ref, np.int32))
        assert diff.max() <= 1, f"{name}: max diff {diff.max()}"  # 1-ulp boundary wiggle

    k1, k2 = jax.random.split(key)
    # module config: Conv2d(4, 8, kernel_size=3, stride=1, padding=1) on (2, 4, 16, 16)
    run_case("basic", 2, 4, 8, 16, 16, 3, 1, 1, 1, 1,
             x_scale=0.05, x_zp=128, out_scale=0.1, out_zp=64, case_key=k1)
    # grouped + strided config with a non-trivial input zero point (exercises the
    # folded zero-point / bias-correction path and the group grid axis)
    run_case("grouped", 2, 8, 16, 10, 10, 3, 2, 1, 1, 2,
             x_scale=0.04, x_zp=100, out_scale=0.08, out_zp=32, case_key=k2)

    print("KERNEL_OK")
</pallas_src>

<mosaic_0001>
module attributes {stable_mosaic.version = 11 : i64} {
  func.func @kernel_single(%arg0: i32, %arg1: i32, %arg2: i32, %arg3: i32, %arg4: memref<2xf32, #tpu.memory_space<smem>>, %arg5: memref<1x512x128xi8, #tpu.memory_space<vmem>>, %arg6: memref<1x128x128xi8, #tpu.memory_space<vmem>>, %arg7: memref<1x1x128xf32, #tpu.memory_space<vmem>>, %arg8: memref<1x512x128xi8, #tpu.memory_space<vmem>>) attributes {dimension_semantics = [#tpu.dimension_semantics<parallel>, #tpu.dimension_semantics<parallel>, #tpu.dimension_semantics<parallel>, #tpu.dimension_semantics<arbitrary>], iteration_bounds = array<i64: 1, 1, 1, 1>, scalar_prefetch = 0 : i64, scratch_operands = 0 : i64, tpu.core_type = #tpu.core_type<tc>, window_params = [{transform_indices = @transform_0, window_bounds = array<i64: 2>}, {transform_indices = @transform_1, window_bounds = array<i64: 1, 512, 128>}, {transform_indices = @transform_2, window_bounds = array<i64: 1, 128, 128>}, {transform_indices = @transform_3, window_bounds = array<i64: 1, 1, 128>}, {transform_indices = @transform_4, window_bounds = array<i64: 1, 512, 128>}]} {
    %c0 = arith.constant 0 : index
    %c0_0 = arith.constant 0 : index
    %c0_1 = arith.constant 0 : index
    %0 = vector.load %arg5[%c0, %c0_0, %c0_1] : memref<1x512x128xi8, #tpu.memory_space<vmem>>, vector<1x512x128xi8>
    %1 = vector.shape_cast %0 : vector<1x512x128xi8> to vector<512x128xi8>
    %c0_2 = arith.constant 0 : index
    %c0_3 = arith.constant 0 : index
    %c0_4 = arith.constant 0 : index
    %2 = vector.load %arg6[%c0_2, %c0_3, %c0_4] : memref<1x128x128xi8, #tpu.memory_space<vmem>>, vector<1x128x128xi8>
    %3 = vector.shape_cast %2 : vector<1x128x128xi8> to vector<128x128xi8>
    %4 = arith.sitofp %1 : vector<512x128xi8> to vector<512x128xbf16>
    %5 = arith.sitofp %3 : vector<128x128xi8> to vector<128x128xbf16>
    %cst = arith.constant dense<0.000000e+00> : vector<512x128xf32>
    %6 = tpu.matmul %4, %5, %cst {dimension_numbers = #tpu.dot_dimension_numbers<[1], [0], [0], [1], [0, 0, 1, 1], [], []>} : vector<512x128xbf16>, vector<128x128xbf16>, vector<512x128xf32> -> vector<512x128xf32>
    %c0_5 = arith.constant 0 : index
    %7 = memref.load %arg4[%c0_5] : memref<2xf32, #tpu.memory_space<smem>>
    %c1 = arith.constant 1 : index
    %8 = memref.load %arg4[%c1] : memref<2xf32, #tpu.memory_space<smem>>
    %9 = vector.broadcast %7 : f32 to vector<512x128xf32>
    %10 = arith.mulf %6, %9 : vector<512x128xf32>
    %c0_6 = arith.constant 0 : index
    %c0_7 = arith.constant 0 : index
    %c0_8 = arith.constant 0 : index
    %11 = vector.load %arg7[%c0_6, %c0_7, %c0_8] : memref<1x1x128xf32, #tpu.memory_space<vmem>>, vector<1x1x128xf32>
    %12 = vector.shape_cast %11 : vector<1x1x128xf32> to vector<1x128xf32>
    %13 = vector.broadcast %12 : vector<1x128xf32> to vector<512x128xf32>
    %14 = arith.addf %10, %13 : vector<512x128xf32>
    %15 = math.roundeven %14 : vector<512x128xf32>
    %16 = vector.broadcast %8 : f32 to vector<512x128xf32>
    %17 = arith.addf %15, %16 : vector<512x128xf32>
    %cst_9 = arith.constant 0.000000e+00 : f32
    %cst_10 = arith.constant 2.550000e+02 : f32
    %18 = vector.broadcast %cst_9 : f32 to vector<512x128xf32>
    %19 = arith.maximumf %18, %17 : vector<512x128xf32>
    %20 = vector.broadcast %cst_10 : f32 to vector<512x128xf32>
    %21 = arith.minimumf %20, %19 : vector<512x128xf32>
    %22 = arith.fptosi %21 : vector<512x128xf32> to vector<512x128xi32>
    %23 = arith.trunci %22 : vector<512x128xi32> to vector<512x128xi8>
    %c0_11 = arith.constant 0 : index
    %c0_12 = arith.constant 0 : index
    %c0_13 = arith.constant 0 : index
    %24 = vector.load %arg8[%c0_11, %c0_12, %c0_13] : memref<1x512x128xi8, #tpu.memory_space<vmem>>, vector<1x512x128xi8>
    %25 = vector.shape_cast %24 : vector<1x512x128xi8> to vector<512x128xi8>
    %26 = vector.shape_cast %23 : vector<512x128xi8> to vector<1x512x128xi8>
    tpu.vector_store %arg8[%c0_11, %c0_12, %c0_13], %26 {strides = array<i32>} : memref<1x512x128xi8, #tpu.memory_space<vmem>>, vector<1x512x128xi8>,
    return
  }
  func.func @transform_0(%arg0: i32, %arg1: i32, %arg2: i32, %arg3: i32) -> i32 {
    %c0_i32 = arith.constant 0 : i32
    %c0_i32_0 = arith.constant 0 : i32
    return %c0_i32 : i32
  }
  func.func @transform_1(%arg0: i32, %arg1: i32, %arg2: i32, %arg3: i32) -> (i32, i32, i32) {
    %c0_i32 = arith.constant 0 : i32
    return %arg0, %arg1, %arg3 : i32, i32, i32
  }
  func.func @transform_2(%arg0: i32, %arg1: i32, %arg2: i32, %arg3: i32) -> (i32, i32, i32) {
    %c0_i32 = arith.constant 0 : i32
    return %arg0, %arg3, %arg2 : i32, i32, i32
  }
  func.func @transform_3(%arg0: i32, %arg1: i32, %arg2: i32, %arg3: i32) -> (i32, i32, i32) {
    %c0_i32 = arith.constant 0 : i32
    %c0_i32_0 = arith.constant 0 : i32
    return %arg0, %c0_i32, %arg2 : i32, i32, i32
  }
  func.func @transform_4(%arg0: i32, %arg1: i32, %arg2: i32, %arg3: i32) -> (i32, i32, i32) {
    %c0_i32 = arith.constant 0 : i32
    return %arg0, %arg1, %arg2 : i32, i32, i32
  }
}

</mosaic_0001>

<bundles_post_ra>
// kernel: tpu_custom_call.1
= control target key start
LH: loop header
LB: loop body
LE: loop exit
PB: predicated region body
PF: predicated region fallthrough
CT: control target
= control target key end

     0   :  { %9 = vsyncpa [#allocation5], 0  ;;  %s2374_s0 = inlined_call_operand.hbm [shape: f32[2], index: 0, kind: input, shape index: {}]   ;;  %s2375_s1 = inlined_call_operand.hbm [shape: s8[1,512,128], index: 1, kind: input, shape index: {}]   ;;  %s2376_s2 = inlined_call_operand.hbm [shape: s8[1,128,128], index: 2, kind: input, shape index: {}]   ;;  %s2377_s3 = inlined_call_operand.vmem [shape: f32[1,1,128], index: 3, kind: input, shape index: {}]   ;;  %s2378_s4 = inlined_call_operand.hbm [shape: u8[1,512,128], index: 4, kind: output, shape index: {}]  }
   0x1   :  { %10 = vsyncpa [#allocation3], 0 }
   0x2   :  { %11 = vsyncpa [#allocation8], 0 }
   0x3   :  { %12 = vsyncpa [#allocation4], 0  ;;  %s1810_s15 = smov [#allocation2]   ;;  %s1811_s18 = smov [#allocation6]  }
   0x4   :  { %20 = dma.hbm_to_smem %s2374_s0, 16, %s1810_s15, [#allocation5]  }
   0x5   :  { %s26_s19 = sshll.u32 %s1811_s18, 4  ;;  %s27_s19 = int_to_ptr.vmem [resolvable:$true] %s26_s19 }
   0x6   :  { %s1750_s20 = scalar_lea.vmem %s27_s19, 2048  ;;  %p1755_p1 = scmp.lt.s32.totalorder %s27_s19, %s27_s19 }
   0x7   :  { %p1751_p0 = scmp.ne.s32.totalorder %s27_s19, %s1750_s20  ;;  %p1756_p2 = scmp.lt.s32.totalorder %s1750_s20, %s1750_s20 }
   0x9   :  { %p1757_p3 = por %p1756_p2, %p1755_p1 }
   0xb   :  { %p1758_p4 = pnand %p1757_p3, %p1751_p0 }
   0xd   :  { %1761 = shalt.err (!%p1758_p4)
}
   0xe   :  { %s1812_s21 = smov 128   ;;  %s1813_s22 = smov 8  }
   0xf   :  { %32 = dma.hbm_to_vmem [thread:$0]  %s2375_s1, 2048, %s27_s19, [#allocation3], %s1812_s21, %s1812_s21, %s1813_s22  }
  0x10   :  { %s1814_s0 = smov [#allocation7]  }
  0x11   :  { %s38_s25 = sshll.u32 %s1814_s0, 4  ;;  %s39_s25 = int_to_ptr.vmem [resolvable:$true] %s38_s25 }
  0x12   :  { %s1770_s26 = scalar_lea.vmem %s39_s25, 512  ;;  %p1775_p6 = scmp.lt.s32.totalorder %s39_s25, %s39_s25 }
  0x13   :  { %p1771_p5 = scmp.ne.s32.totalorder %s39_s25, %s1770_s26  ;;  %p1776_p7 = scmp.lt.s32.totalorder %s1770_s26, %s1770_s26 }
  0x15   :  { %p1777_p8 = por %p1776_p7, %p1775_p6 }
  0x17   :  { %p1778_p9 = pnand %p1777_p8, %p1771_p5 }
  0x19   :  { %1781 = shalt.err (!%p1778_p9)
}
  0x1a   :  { %44 = dma.hbm_to_vmem [thread:$0]  %s2376_s2, 512, %s39_s25, [#allocation8], %s1812_s21, %s1812_s21, %s1813_s22  }
  0x1b   :  { %1802 = dma.done.wait [#allocation5], 16  }
  0x1c   :  { %1803 = vsyncadd [#allocation5], 4294967280 }
  0x1d   :  { %1804 = dma.done.wait [#allocation3], 2048  }
  0x1e   :  { %1805 = vsyncadd [#allocation3], 4294965248 }
  0x1f   :  { %1806 = dma.done.wait [#allocation8], 512  }
  0x20   :  { %1807 = vsyncadd [#allocation8], 4294966784 }
  0x21   :  { %56 = sfence }
  0x22   :  { %v77_v0 = vld [vmem:[#allocation7 + $0x18] sm:$0xff]  ;;  %v58_v3 = vld [vmem:[#allocation6] sm:$0xff]  ;;  %v76_v5 = vld [vmem:[#allocation7 + $0x10] sm:$0xff]  ;;  %s407_s1 = sld [smem:[#allocation2]] }
  0x23   :  { %v117_v1 = vunpack.c.h.s8.bf16 %v77_v0  ;;  %v116_v2 = vunpack.c.l.s8.bf16 %v77_v0  ;;  %v66_v4 = vld [vmem:[#allocation6 + $0x40] sm:$0xff]  ;;  %v78_v6 = vunpack.c.l.s8.bf16 %v58_v3  ;;  %v115_v8 = vunpack.c.h.s8.bf16 %v76_v5  ;;  %v75_v10 = vld [vmem:[#allocation7 + $0x8] sm:$0xff]  ;;  %v60_v22 = vld [vmem:[#allocation6 + $0x10] sm:$0xff]  ;;  %s949_s2 = sld [smem:[#allocation2 + $0x1]] }
  0x24   :  { %v94_v7 = vunpack.c.l.s8.bf16 %v66_v4  ;;  %v114_v9 = vunpack.c.l.s8.bf16 %v76_v5  ;;  %v113_v11 = vunpack.c.h.s8.bf16 %v75_v10  ;;  %v112_v12 = vunpack.c.l.s8.bf16 %v75_v10  ;;  %v74_v13 = vld [vmem:[#allocation7] sm:$0xff]  ;;  %v59_v16 = vld [vmem:[#allocation6 + $0x8] sm:$0xff]  ;;  %v68_v23 = vld [vmem:[#allocation6 + $0x50] sm:$0xff] }
  0x25   :  { %991 = vmatprep.subr.bf16.mxu0 %v117_v1  ;;  %1071 = vmatprep.subr.bf16.mxu1 %v117_v1  ;;  %v111_v14 = vunpack.c.h.s8.bf16 %v74_v13  ;;  %v110_v15 = vunpack.c.l.s8.bf16 %v74_v13  ;;  %v67_v17 = vld [vmem:[#allocation6 + $0x48] sm:$0xff]  ;;  %v79_v18 = vunpack.c.h.s8.bf16 %v58_v3  ;;  %v95_v19 = vunpack.c.h.s8.bf16 %v66_v4  ;;  %v61_v28 = vld [vmem:[#allocation6 + $0x18] sm:$0xff]  ;;  %v62_v34 = vld [vmem:[#allocation6 + $0x20] sm:$0xff] }
  0x26   :  { %992 = vmatpush3.bf16.msra.mxu0 %v117_v1  ;;  %1079 = vmatpush3.bf16.msra.mxu1 %v117_v1  ;;  %v80_v20 = vunpack.c.l.s8.bf16 %v59_v16  ;;  %v96_v21 = vunpack.c.l.s8.bf16 %v67_v17  ;;  %v81_v24 = vunpack.c.h.s8.bf16 %v59_v16  ;;  %v97_v25 = vunpack.c.h.s8.bf16 %v67_v17  ;;  %v69_v29 = vld [vmem:[#allocation6 + $0x58] sm:$0xff]  ;;  %v70_v35 = vld [vmem:[#allocation6 + $0x60] sm:$0xff]  ;;  %v63_v40 = vld [vmem:[#allocation6 + $0x28] sm:$0xff] }
  0x27   :  { %993 = vmatprep.subr.bf16.mxu0 %v116_v2  ;;  %1072 = vmatprep.subr.bf16.mxu1 %v116_v2  ;;  %v82_v26 = vunpack.c.l.s8.bf16 %v60_v22  ;;  %v98_v27 = vunpack.c.l.s8.bf16 %v68_v23  ;;  %v83_v30 = vunpack.c.h.s8.bf16 %v60_v22  ;;  %v99_v31 = vunpack.c.h.s8.bf16 %v68_v23  ;;  %v71_v41 = vld [vmem:[#allocation6 + $0x68] sm:$0xff]  ;;  %v64_v46 = vld [vmem:[#allocation6 + $0x30] sm:$0xff]  ;;  %v65_v52 = vld [vmem:[#allocation6 + $0x38] sm:$0xff] }
  0x28   :  { %1007 = vmatprep.mubr.bf16.mxu0 %v78_v6  ;;  %1039 = vmatprep.mubr.bf16.mxu1 %v94_v7  ;;  %v84_v32 = vunpack.c.l.s8.bf16 %v61_v28  ;;  %v100_v33 = vunpack.c.l.s8.bf16 %v69_v29  ;;  %v85_v36 = vunpack.c.h.s8.bf16 %v61_v28  ;;  %v101_v37 = vunpack.c.h.s8.bf16 %v69_v29  ;;  %v72_v47 = vld [vmem:[#allocation6 + $0x70] sm:$0xff]  ;;  %v73_v53 = vld [vmem:[#allocation6 + $0x78] sm:$0xff]  ;;  %v1861_v62 = vld [vmem:[%s2377_s3] ss:$0 sm:$0xff] }
  0x29   :  { %v86_v38 = vunpack.c.l.s8.bf16 %v62_v34  ;;  %v102_v39 = vunpack.c.l.s8.bf16 %v70_v35  ;;  %v87_v42 = vunpack.c.h.s8.bf16 %v62_v34  ;;  %v103_v43 = vunpack.c.h.s8.bf16 %v70_v35 }
  0x2a   :  { %994 = vmatpush3.bf16.msra.mxu0 %v116_v2  ;;  %1080 = vmatpush3.bf16.msra.mxu1 %v116_v2  ;;  %v88_v44 = vunpack.c.l.s8.bf16 %v63_v40  ;;  %v104_v45 = vunpack.c.l.s8.bf16 %v71_v41  ;;  %v89_v48 = vunpack.c.h.s8.bf16 %v63_v40  ;;  %v105_v49 = vunpack.c.h.s8.bf16 %v71_v41 }
  0x2b   :  { %995 = vmatprep.subr.bf16.mxu0 %v115_v8  ;;  %1073 = vmatprep.subr.bf16.mxu1 %v115_v8  ;;  %v90_v50 = vunpack.c.l.s8.bf16 %v64_v46  ;;  %v106_v51 = vunpack.c.l.s8.bf16 %v72_v47  ;;  %v91_v54 = vunpack.c.h.s8.bf16 %v64_v46  ;;  %v107_v55 = vunpack.c.h.s8.bf16 %v72_v47 }
  0x2c   :  { %v92_v56 = vunpack.c.l.s8.bf16 %v65_v52  ;;  %v108_v57 = vunpack.c.l.s8.bf16 %v73_v53  ;;  %v93_v58 = vunpack.c.h.s8.bf16 %v65_v52  ;;  %v109_v59 = vunpack.c.h.s8.bf16 %v73_v53 }
  0x2d   :  { %v1856_v60 = vstv %s407_s1 }
  0x2e   :  { %996 = vmatpush3.bf16.msra.mxu0 %v115_v8  ;;  %1081 = vmatpush3.bf16.msra.mxu1 %v115_v8 }
  0x2f   :  { %997 = vmatprep.subr.bf16.mxu0 %v114_v9  ;;  %1074 = vmatprep.subr.bf16.mxu1 %v114_v9 }
  0x32   :  { %998 = vmatpush3.bf16.msra.mxu0 %v114_v9  ;;  %1082 = vmatpush3.bf16.msra.mxu1 %v114_v9 }
  0x33   :  { %999 = vmatprep.subr.bf16.mxu0 %v113_v11  ;;  %1075 = vmatprep.subr.bf16.mxu1 %v113_v11 }
  0x36   :  { %1000 = vmatpush3.bf16.msra.mxu0 %v113_v11  ;;  %1083 = vmatpush3.bf16.msra.mxu1 %v113_v11 }
  0x37   :  { %1001 = vmatprep.subr.bf16.mxu0 %v112_v12  ;;  %1076 = vmatprep.subr.bf16.mxu1 %v112_v12 }
  0x3a   :  { %1002 = vmatpush3.bf16.msra.mxu0 %v112_v12  ;;  %1084 = vmatpush3.bf16.msra.mxu1 %v112_v12  ;;  %v1869_v12 = vstv %s949_s2 }
  0x3b   :  { %1003 = vmatprep.subr.bf16.mxu0 %v111_v14  ;;  %1077 = vmatprep.subr.bf16.mxu1 %v111_v14 }
  0x3e   :  { %1004 = vmatpush3.bf16.msra.mxu0 %v111_v14  ;;  %1085 = vmatpush3.bf16.msra.mxu1 %v111_v14 }
  0x3f   :  { %1005 = vmatprep.subr.bf16.mxu0 %v110_v15  ;;  %1078 = vmatprep.subr.bf16.mxu1 %v110_v15 }
  0x42   :  { %1006 = vmatpush3.bf16.msra.mxu0 %v110_v15  ;;  %1086 = vmatpush3.bf16.msra.mxu1 %v110_v15 }
  0x45   :  { %1008 = vmatmul.mubr.bf16.vlgmr.msra.gmra.mxu0 %v79_v18  ;;  %1040 = vmatmul.mubr.bf16.vlgmr.msra.gmra.mxu1 %v95_v19 }
  0x46   :  { %1011 = vmatprep.mubr.bf16.mxu0 %v80_v20  ;;  %1043 = vmatprep.mubr.bf16.mxu1 %v96_v21 }
  0x4d   :  { %1012 = vmatmul.mubr.bf16.gmra.mxu0 %v81_v24  ;;  %1044 = vmatmul.mubr.bf16.gmra.mxu1 %v97_v25 }
  0x4e   :  { %1015 = vmatprep.mubr.bf16.mxu0 %v82_v26  ;;  %1047 = vmatprep.mubr.bf16.mxu1 %v98_v27 }
  0x55   :  { %1016 = vmatmul.mubr.bf16.gmra.mxu0 %v83_v30  ;;  %1048 = vmatmul.mubr.bf16.gmra.mxu1 %v99_v31 }
  0x56   :  { %1019 = vmatprep.mubr.bf16.mxu0 %v84_v32  ;;  %1051 = vmatprep.mubr.bf16.mxu1 %v100_v33 }
  0x5d   :  { %1020 = vmatmul.mubr.bf16.gmra.mxu0 %v85_v36  ;;  %1052 = vmatmul.mubr.bf16.gmra.mxu1 %v101_v37 }
  0x5e   :  { %1023 = vmatprep.mubr.bf16.mxu0 %v86_v38  ;;  %1055 = vmatprep.mubr.bf16.mxu1 %v102_v39 }
  0x65   :  { %1024 = vmatmul.mubr.bf16.gmra.mxu0 %v87_v42  ;;  %1056 = vmatmul.mubr.bf16.gmra.mxu1 %v103_v43 }
  0x66   :  { %1027 = vmatprep.mubr.bf16.mxu0 %v88_v44  ;;  %1059 = vmatprep.mubr.bf16.mxu1 %v104_v45 }
  0x6d   :  { %1028 = vmatmul.mubr.bf16.gmra.mxu0 %v89_v48  ;;  %1060 = vmatmul.mubr.bf16.gmra.mxu1 %v105_v49 }
  0x6e   :  { %1031 = vmatprep.mubr.bf16.mxu0 %v90_v50  ;;  %1063 = vmatprep.mubr.bf16.mxu1 %v106_v51 }
  0x75   :  { %1032 = vmatmul.mubr.bf16.gmra.mxu0 %v91_v54  ;;  %1064 = vmatmul.mubr.bf16.gmra.mxu1 %v107_v55 }
  0x76   :  { %1035 = vmatprep.mubr.bf16.mxu0 %v92_v56  ;;  %1067 = vmatprep.mubr.bf16.mxu1 %v108_v57 }
  0x7d   :  { %1036 = vmatmul.mubr.bf16.gmra.mxu0 %v93_v58  ;;  %1068 = vmatmul.mubr.bf16.gmra.mxu1 %v109_v59 }
 0x105   :  { %v1009_v61 = vpop.f32.mrf.mxu0  ;;  %v1041_v63 = vpop.f32.mrf.mxu1 }
 0x106   :  { %v412_v0 = vmul.f32 %v1009_v61, %v1856_v60  ;;  %v444_v1 = vmul.f32 %v1041_v63, %v1856_v60 }
 0x107   :  { %v152_v2 = vpop.f32.mrf.mxu0  ;;  %v280_v3 = vpop.f32.mrf.mxu1 }
 0x108   :  { %v483_v4 = vadd.f32 %v1861_v62, %v412_v0  ;;  %v515_v5 = vadd.f32 %v1861_v62, %v444_v1  ;;  %v410_v6 = vmul.f32 %v1856_v60, %v152_v2  ;;  %v442_v7 = vmul.f32 %v1856_v60, %v280_v3 }
 0x109   :  { %v1010_v8 = vpop.f32.mrf.mxu0  ;;  %v1042_v24 = vpop.f32.mrf.mxu1 }
 0x10a   :  { %v1103_v9 = vand.u32 2147483647, %v483_v4  ;;  %v1105_v10 = vcvt.f32.s32 %v483_v4  ;;  %v1359_v11 = vand.u32 2147483647, %v515_v5  ;;  %v1361_v13 = vcvt.f32.s32 %v515_v5 }
 0x10b   :  { %v481_v14 = vadd.f32 %v1861_v62, %v410_v6  ;;  %v513_v15 = vadd.f32 %v1861_v62, %v442_v7  ;;  %v1108_v17 = vand.u32 2147483648, %v483_v4  ;;  %v1364_v18 = vand.u32 2147483648, %v515_v5  ;;  %v155_v56 = vpop.f32.mrf.mxu0  ;;  %v283_v7 = vpop.f32.mrf.mxu1 }
 0x10c   :  { %v1106_v16 = vcvt.s32.f32 %v1105_v10  ;;  %v413_v19 = vmul.f32 %v1010_v8, %v1856_v60  ;;  %vm1874_vm0 = vcmp.lt.f32.partialorder %v1103_v9, 8388608.0  ;;  %vm1878_vm1 = vcmp.lt.f32.partialorder %v1359_v11, 8388608.0 }
 0x10d   :  { %v1362_v22 = vcvt.s32.f32 %v1361_v13  ;;  %v1089_v23 = vcvt.f32.s32 %v481_v14  ;;  %v1087_v26 = vand.u32 2147483647, %v481_v14  ;;  %v1092_v27 = vand.u32 2147483648, %v481_v14 }
 0x10e   :  { %v1107_v25 = vand.u32 2147483647, %v1106_v16  ;;  %v1345_v28 = vcvt.f32.s32 %v513_v15  ;;  %v1343_v31 = vand.u32 2147483647, %v513_v15  ;;  %v484_v32 = vadd.f32 %v1861_v62, %v413_v19 }
 0x10f   :  { %v1363_v29 = vand.u32 2147483647, %v1362_v22  ;;  %v1090_v30 = vcvt.s32.f32 %v1089_v23  ;;  %v1348_v35 = vand.u32 2147483648, %v513_v15  ;;  %v445_v36 = vmul.f32 %v1042_v24, %v1856_v60 }
 0x110   :  { %v1109_v33 = vor.u32 %v1108_v17, %v1107_v25  ;;  %v1346_v34 = vcvt.s32.f32 %v1345_v28  ;;  %v1111_v39 = vand.u32 2147483647, %v484_v32  ;;  %v1113_v40 = vcvt.f32.s32 %v484_v32  ;;  %v1013_v17 = vpop.f32.mrf.mxu0 }
 0x111   :  { %v1365_v37 = vor.u32 %v1364_v18, %v1363_v29  ;;  %v1091_v38 = vand.u32 2147483647, %v1090_v30  ;;  %vm1886_vm2 = vcmp.lt.f32.partialorder %v1087_v26, 8388608.0  ;;  %v516_v44 = vadd.f32 %v1861_v62, %v445_v36  ;;  %v1045_v29 = vpop.f32.mrf.mxu1 }
 0x112   :  { %v1110_v41 = vsel %vm1874_vm0, %v1109_v33, %v483_v4  ;;  %v1347_v43 = vand.u32 2147483647, %v1346_v34  ;;  %vm1344_vm3 = vcmp.lt.f32.partialorder %v1343_v31, 8388608.0  ;;  %v1114_v50 = vcvt.s32.f32 %v1113_v40  ;;  %v168_v34 = vpop.f32.mrf.mxu0 }
 0x113   :  { %v612_v45 = vadd.f32 %v1110_v41, %v1869_v12  ;;  %v1366_v46 = vsel %vm1878_vm1, %v1365_v37, %v515_v5  ;;  %v1093_v47 = vor.u32 %v1092_v27, %v1091_v38  ;;  %v1116_v51 = vand.u32 2147483648, %v484_v32 }
 0x114   :  { %v644_v48 = vadd.f32 %v1366_v46, %v1869_v12  ;;  %v1349_v49 = vor.u32 %v1348_v35, %v1347_v43  ;;  %vm1897_vm4 = vcmp.lt.f32.partialorder %v1111_v39, 8388608.0  ;;  %v1369_v55 = vcvt.f32.s32 %v516_v44 }
 0x115   :  { %v676_v52 = vmax.f32 %v612_v45, 0.0  ;;  %v1094_v53 = vsel %vm1886_vm2, %v1093_v47, %v481_v14  ;;  %v1115_v61 = vand.u32 2147483647, %v1114_v50  ;;  %v1367_v1 = vand.u32 2147483647, %v516_v44 }
 0x116   :  { %v708_v57 = vmax.f32 %v644_v48, 0.0  ;;  %v610_v58 = vadd.f32 %v1094_v53, %v1869_v12  ;;  %v1350_v59 = vsel %vm1344_vm3, %v1349_v49, %v513_v15  ;;  %v1370_v2 = vcvt.s32.f32 %v1369_v55 }
 0x117   :  { %v740_v63 = vmin.f32 %v676_v52, 255.0  ;;  %v642_v0 = vadd.f32 %v1350_v59, %v1869_v12  ;;  %v1117_v5 = vor.u32 %v1116_v51, %v1115_v61  ;;  %v411_v6 = vmul.f32 %v1856_v60, %v155_v56 }
 0x118   :  { %v772_v3 = vmin.f32 %v708_v57, 255.0  ;;  %v674_v4 = vmax.f32 %v610_v58, 0.0  ;;  %v1371_v10 = vand.u32 2147483647, %v1370_v2  ;;  %v1372_v11 = vand.u32 2147483648, %v516_v44 }
 0x119   :  { %v1603_v8 = vtrunc.f32 %v740_v63  ;;  %v706_v9 = vmax.f32 %v642_v0, 0.0  ;;  %v1118_v15 = vsel %vm1897_vm4, %v1117_v5, %v484_v32  ;;  %v482_v16 = vadd.f32 %v1861_v62, %v411_v6 }
 0x11a   :  { %v1667_v13 = vtrunc.f32 %v772_v3  ;;  %v738_v14 = vmin.f32 %v674_v4, 255.0  ;;  %v613_v19 = vadd.f32 %v1118_v15, %v1869_v12  ;;  %v1373_v20 = vor.u32 %v1372_v11, %v1371_v10 }
 0x11b   :  { %v770_v18 = vmin.f32 %v706_v9, 255.0  ;;  %v443_v21 = vmul.f32 %v1856_v60, %v283_v7  ;;  %vm1368_vm5 = vcmp.lt.f32.partialorder %v1367_v1, 8388608.0  ;;  %v1095_v23 = vand.u32 2147483647, %v482_v16  ;;  %v296_v9 = vpop.f32.mrf.mxu1 }
 0x11c   :  { %v1599_v22 = vtrunc.f32 %v738_v14  ;;  %v1097_v24 = vcvt.f32.s32 %v482_v16  ;;  %v1909_v25 = vcvt.f32.s32 %v1603_v8  ;;  %v1911_v26 = vcvt.f32.s32 %v1667_v13 }
 0x11d   :  { %v677_v27 = vmax.f32 %v613_v19, 0.0  ;;  %v1374_v28 = vsel %vm1368_vm5, %v1373_v20, %v516_v44  ;;  %v1663_v30 = vtrunc.f32 %v770_v18  ;;  %v1100_v33 = vand.u32 2147483648, %v482_v16  ;;  %v1014_v19 = vpop.f32.mrf.mxu0 }
 0x11e   :  { %v645_v31 = vadd.f32 %v1374_v28, %v1869_v12  ;;  %v1098_v32 = vcvt.s32.f32 %v1097_v24  ;;  %v1914_v35 = vcvt.f32.s32 %v1599_v22  ;;  %v514_v37 = vadd.f32 %v1861_v62, %v443_v21  ;;  %v1046_v28 = vpop.f32.mrf.mxu1 }
 0x11f   :  { %v741_v36 = vmin.f32 %v677_v27, 255.0  ;;  %v416_v38 = vmul.f32 %v1013_v17, %v1856_v60  ;;  %vm1918_vm6 = vcmp.lt.f32.partialorder %v1095_v23, 8388608.0  ;;  %v448_v42 = vmul.f32 %v1045_v29, %v1856_v60 }
 0x120   :  { %v709_v39 = vmax.f32 %v645_v31, 0.0  ;;  %v1099_v41 = vand.u32 2147483647, %v1098_v32  ;;  %v1351_v44 = vand.u32 2147483647, %v514_v37  ;;  %v1353_v45 = vcvt.f32.s32 %v514_v37 }
 0x121   :  { %v1605_v43 = vtrunc.f32 %v741_v36  ;;  %v414_v46 = vmul.f32 %v1856_v60, %v168_v34  ;;  %v487_v49 = vadd.f32 %v1861_v62, %v416_v38  ;;  %v519_v50 = vadd.f32 %v1861_v62, %v448_v42 }
 0x122   :  { %v773_v47 = vmin.f32 %v709_v39, 255.0  ;;  %v1101_v48 = vor.u32 %v1100_v33, %v1099_v41  ;;  %v1926_v51 = vcvt.f32.s32 %v1663_v30  ;;  %v1354_v53 = vcvt.s32.f32 %v1353_v45 }
 0x123   :  { %v1606_v52 = vcvt.f32.s32 %v1605_v43  ;;  %v1356_v54 = vand.u32 2147483648, %v514_v37  ;;  %v1135_v57 = vand.u32 2147483647, %v487_v49  ;;  %v1137_v58 = vcvt.f32.s32 %v487_v49 }
 0x124   :  { %v1669_v55 = vtrunc.f32 %v773_v47  ;;  %v1102_v56 = vsel %vm1918_vm6, %v1101_v48, %v482_v16  ;;  %vm1931_vm7 = vcmp.lt.f32.partialorder %v1351_v44, 8388608.0  ;;  %v1355_v63 = vand.u32 2147483647, %v1354_v53 }
 0x125   :  { %v611_v59 = vadd.f32 %v1102_v56, %v1869_v12  ;;  %v485_v0 = vadd.f32 %v1861_v62, %v414_v46  ;;  %v867_v1 = vpack.c.b16 %v1606_v52, %v1909_v25  ;;  %v1138_v3 = vcvt.s32.f32 %v1137_v58 }
 0x126   :  { %v1937_v2 = vcvt.f32.s32 %v1669_v55  ;;  %v1391_v4 = vand.u32 2147483647, %v519_v50  ;;  %v1357_v6 = vor.u32 %v1356_v54, %v1355_v63  ;;  %v1140_v7 = vand.u32 2147483648, %v487_v49 }
 0x127   :  { %v675_v5 = vmax.f32 %v611_v59, 0.0  ;;  %v1393_v8 = vcvt.f32.s32 %v519_v50  ;;  %vm1941_vm8 = vcmp.lt.f32.partialorder %v1135_v57, 8388608.0  ;;  %v1139_v13 = vand.u32 2147483647, %v1138_v3 }
 0x128   :  { %v891_v10 = vpack.c.b16 %v1937_v2, %v1911_v26  ;;  %v1396_v14 = vand.u32 2147483648, %v519_v50  ;;  %v1358_v16 = vsel %vm1931_vm7, %v1357_v6, %v514_v37  ;;  %v1121_v18 = vcvt.f32.s32 %v485_v0 }
 0x129   :  { %v739_v15 = vmin.f32 %v675_v5, 255.0  ;;  %v1394_v17 = vcvt.s32.f32 %v1393_v8  ;;  %v643_v20 = vadd.f32 %v1358_v16, %v1869_v12  ;;  %v1141_v21 = vor.u32 %v1140_v7, %v1139_v13  ;;  %v171_v7 = vpop.f32.mrf.mxu0 }
 0x12a   :  { %vm1948_vm9 = vcmp.lt.f32.partialorder %v1391_v4, 8388608.0  ;;  %v1119_v23 = vand.u32 2147483647, %v485_v0  ;;  %v1122_v26 = vcvt.s32.f32 %v1121_v18  ;;  %v446_v27 = vmul.f32 %v1856_v60, %v296_v9 }
 0x12b   :  { %v1601_v24 = vtrunc.f32 %v739_v15  ;;  %v1395_v25 = vand.u32 2147483647, %v1394_v17  ;;  %v707_v29 = vmax.f32 %v643_v20, 0.0  ;;  %v1142_v30 = vsel %vm1941_vm8, %v1141_v21, %v487_v49 }
 0x12c   :  { %v1124_v31 = vand.u32 2147483648, %v485_v0  ;;  %v417_v32 = vmul.f32 %v1014_v19, %v1856_v60  ;;  %v616_v34 = vadd.f32 %v1142_v30, %v1869_v12  ;;  %v1123_v37 = vand.u32 2147483647, %v1122_v26 }
 0x12d   :  { %v1602_v33 = vcvt.f32.s32 %v1601_v24  ;;  %v1397_v36 = vor.u32 %v1396_v14, %v1395_v25  ;;  %v771_v38 = vmin.f32 %v707_v29, 255.0  ;;  %v517_v39 = vadd.f32 %v1861_v62, %v446_v27  ;;  %v299_v14 = vpop.f32.mrf.mxu1  ;;  %v1017_v29 = vpop.f32.mrf.mxu0 }
 0x12e   :  { %v488_v40 = vadd.f32 %v1861_v62, %v417_v32  ;;  %v449_v41 = vmul.f32 %v1046_v28, %v1856_v60  ;;  %v680_v43 = vmax.f32 %v616_v34, 0.0  ;;  %v1125_v45 = vor.u32 %v1124_v31, %v1123_v37 }
 0x12f   :  { %v866_v42 = vpack.c.b16 %v1602_v33, %v1914_v35  ;;  %v1398_v44 = vsel %vm1948_vm9, %v1397_v36, %v519_v50  ;;  %v1665_v46 = vtrunc.f32 %v771_v38  ;;  %vm1120_vm10 = vcmp.lt.f32.partialorder %v1119_v23, 8388608.0  ;;  %v1049_v30 = vpop.f32.mrf.mxu1 }
 0x130   :  { %v648_v47 = vadd.f32 %v1398_v44, %v1869_v12  ;;  %v1377_v48 = vcvt.f32.s32 %v517_v39  ;;  %v744_v52 = vmin.f32 %v680_v43, 255.0  ;;  %v1126_v53 = vsel %vm1120_vm10, %v1125_v45, %v485_v0 }
 0x131   :  { %v868_v49 = vpack.c.b8 %v867_v1, %v866_v42  ;;  %v1375_v54 = vand.u32 2147483647, %v517_v39  ;;  %v1666_v55 = vcvt.f32.s32 %v1665_v46  ;;  %v614_v57 = vadd.f32 %v1126_v53, %v1869_v12 }
 0x132   :  { %v712_v56 = vmax.f32 %v648_v47, 0.0  ;;  %v520_v35 = vadd.f32 %v1861_v62, %v449_v41  ;;  %v1611_v58 = vtrunc.f32 %v744_v52  ;;  %v1378_v59 = vcvt.s32.f32 %v1377_v48 }
 0x133   :  { %914 = vst [vmem:[#allocation9] sm:$0xff] %v868_v49  ;;  %v1380_v50 = vand.u32 2147483648, %v517_v39  ;;  %v1145_v61 = vcvt.f32.s32 %v488_v40  ;;  %v890_v63 = vpack.c.b16 %v1666_v55, %v1926_v51  ;;  %v678_v3 = vmax.f32 %v614_v57, 0.0 }
 0x134   :  { %v776_v2 = vmin.f32 %v712_v56, 255.0  ;;  %v1143_v4 = vand.u32 2147483647, %v488_v40  ;;  %vm1967_vm11 = vcmp.lt.f32.partialorder %v1375_v54, 8388608.0  ;;  %v1379_v0 = vand.u32 2147483647, %v1378_v59 }
 0x135   :  { %v1146_v5 = vcvt.s32.f32 %v1145_v61  ;;  %v1148_v6 = vand.u32 2147483648, %v488_v40  ;;  %v892_v8 = vpack.c.b8 %v891_v10, %v890_v63  ;;  %v742_v11 = vmin.f32 %v678_v3, 255.0 }
 0x136   :  { %v1675_v9 = vtrunc.f32 %v776_v2  ;;  %v1399_v13 = vand.u32 2147483647, %v520_v35  ;;  %v1971_v15 = vcvt.f32.s32 %v1611_v58  ;;  %v1381_v16 = vor.u32 %v1380_v50, %v1379_v0  ;;  %v184_v58 = vpop.f32.mrf.mxu0 }
 0x137   :  { %v1147_v51 = vand.u32 2147483647, %v1146_v5  ;;  %v1401_v17 = vcvt.f32.s32 %v520_v35  ;;  %922 = vst [vmem:[#allocation9 + $0x40] sm:$0xff] %v892_v8  ;;  %v1607_v18 = vtrunc.f32 %v742_v11  ;;  %vm1973_vm12 = vcmp.lt.f32.partialorder %v1143_v4, 8388608.0 }
 0x138   :  { %v1404_v20 = vand.u32 2147483648, %v520_v35  ;;  %v415_v21 = vmul.f32 %v1856_v60, %v171_v7  ;;  %v1382_v10 = vsel %vm1967_vm11, %v1381_v16, %v517_v39  ;;  %v447_v24 = vmul.f32 %v1856_v60, %v299_v14 }
 0x139   :  { %v1149_v22 = vor.u32 %v1148_v6, %v1147_v51  ;;  %v1402_v23 = vcvt.s32.f32 %v1401_v17  ;;  %v1981_v25 = vcvt.f32.s32 %v1675_v9  ;;  %v646_v26 = vadd.f32 %v1382_v10, %v1869_v12 }
 0x13a   :  { %vm1984_vm13 = vcmp.lt.f32.partialorder %v1399_v13, 8388608.0  ;;  %v486_v28 = vadd.f32 %v1861_v62, %v415_v21  ;;  %v1989_v31 = vcvt.f32.s32 %v1607_v18  ;;  %v518_v34 = vadd.f32 %v1861_v62, %v447_v24  ;;  %v1018_v24 = vpop.f32.mrf.mxu0 }
 0x13b   :  { %v1150_v32 = vsel %vm1973_vm12, %v1149_v22, %v488_v40  ;;  %v1403_v33 = vand.u32 2147483647, %v1402_v23  ;;  %v710_v36 = vmax.f32 %v646_v26, 0.0  ;;  %v420_v43 = vmul.f32 %v1017_v29, %v1856_v60 }
 0x13c   :  { %v617_v37 = vadd.f32 %v1150_v32, %v1869_v12  ;;  %v1127_v38 = vand.u32 2147483647, %v486_v28  ;;  %v1129_v39 = vcvt.f32.s32 %v486_v28  ;;  %v1385_v42 = vcvt.f32.s32 %v518_v34 }
 0x13d   :  { %v1405_v41 = vor.u32 %v1404_v20, %v1403_v33  ;;  %v452_v44 = vmul.f32 %v1049_v30, %v1856_v60  ;;  %v774_v45 = vmin.f32 %v710_v36, 255.0  ;;  %v1383_v48 = vand.u32 2147483647, %v518_v34  ;;  %v312_v20 = vpop.f32.mrf.mxu1 }
 0x13e   :  { %v681_v46 = vmax.f32 %v617_v37, 0.0  ;;  %v1130_v47 = vcvt.s32.f32 %v1129_v39  ;;  %vm1999_vm14 = vcmp.lt.f32.partialorder %v1127_v38, 8388608.0  ;;  %v1132_v52 = vand.u32 2147483648, %v486_v28 }
 0x13f   :  { %v1406_v40 = vsel %vm1984_vm13, %v1405_v41, %v520_v35  ;;  %v1386_v53 = vcvt.s32.f32 %v1385_v42  ;;  %v1388_v57 = vand.u32 2147483648, %v518_v34  ;;  %v1671_v59 = vtrunc.f32 %v774_v45 }
 0x140   :  { %v745_v54 = vmin.f32 %v681_v46, 255.0  ;;  %v649_v55 = vadd.f32 %v1406_v40, %v1869_v12  ;;  %v1131_v56 = vand.u32 2147483647, %v1130_v47  ;;  %v491_v61 = vadd.f32 %v1861_v62, %v420_v43 }
 0x141   :  { %v1387_v50 = vand.u32 2147483647, %v1386_v53  ;;  %v2006_v63 = vadd.f32 %v1861_v62, %v452_v44  ;;  %vm1384_vm15 = vcmp.lt.f32.partialorder %v1383_v48, 8388608.0  ;;  %v418_v5 = vmul.f32 %v1856_v60, %v184_v58  ;;  %v1050_v48 = vpop.f32.mrf.mxu1 }
 0x142   :  { %v1613_v35 = vtrunc.f32 %v745_v54  ;;  %v713_v2 = vmax.f32 %v649_v55, 0.0  ;;  %v1133_v3 = vor.u32 %v1132_v52, %v1131_v56  ;;  %v1167_v1 = vand.u32 2147483647, %v491_v61 }
 0x143   :  { %v1389_v4 = vor.u32 %v1388_v57, %v1387_v50  ;;  %v1169_v0 = vcvt.f32.s32 %v491_v61  ;;  %v1423_v9 = vand.u32 2147483647, %v2006_v63  ;;  %v1672_v11 = vcvt.f32.s32 %v1671_v59 }
 0x144   :  { %v1614_v6 = vcvt.f32.s32 %v1613_v35  ;;  %v777_v7 = vmin.f32 %v713_v2, 255.0  ;;  %v1134_v8 = vsel %vm1999_vm14, %v1133_v3, %v486_v28  ;;  %vm2014_vm0 = vcmp.lt.f32.partialorder %v1167_v1, 8388608.0 }
 0x145   :  { %v615_v13 = vadd.f32 %v1134_v8, %v1869_v12  ;;  %v1390_v14 = vsel %vm1384_vm15, %v1389_v4, %v518_v34  ;;  %v1170_v16 = vcvt.s32.f32 %v1169_v0  ;;  %v1172_v19 = vand.u32 2147483648, %v491_v61 }
 0x146   :  { %v1677_v51 = vtrunc.f32 %v777_v7  ;;  %v647_v17 = vadd.f32 %v1390_v14, %v1869_v12  ;;  %v870_v21 = vpack.c.b16 %v1614_v6, %v1971_v15  ;;  %v1425_v23 = vcvt.f32.s32 %v2006_v63 }
 0x147   :  { %v679_v10 = vmax.f32 %v615_v13, 0.0  ;;  %v1171_v22 = vand.u32 2147483647, %v1170_v16  ;;  %vm2020_vm1 = vcmp.lt.f32.partialorder %v1423_v9, 8388608.0  ;;  %v489_v29 = vadd.f32 %v1861_v62, %v418_v5  ;;  %v187_v13 = vpop.f32.mrf.mxu0 }
 0x148   :  { %v1678_v26 = vcvt.f32.s32 %v1677_v51  ;;  %v711_v27 = vmax.f32 %v647_v17, 0.0  ;;  %v1426_v33 = vcvt.s32.f32 %v1425_v23  ;;  %v450_v34 = vmul.f32 %v1856_v60, %v312_v20  ;;  %v315_v20 = vpop.f32.mrf.mxu1 }
 0x149   :  { %v743_v30 = vmin.f32 %v679_v10, 255.0  ;;  %v1173_v32 = vor.u32 %v1172_v19, %v1171_v22  ;;  %v1428_v15 = vand.u32 2147483648, %v2006_v63  ;;  %v1153_v37 = vcvt.f32.s32 %v489_v29  ;;  %v1021_v28 = vpop.f32.mrf.mxu0 }
 0x14a   :  { %v775_v36 = vmin.f32 %v711_v27, 255.0  ;;  %v421_v38 = vmul.f32 %v1018_v24, %v1856_v60  ;;  %v894_v39 = vpack.c.b16 %v1678_v26, %v1981_v25  ;;  %v1427_v43 = vand.u32 2147483647, %v1426_v33 }
 0x14b   :  { %v1609_v41 = vtrunc.f32 %v743_v30  ;;  %v1174_v42 = vsel %vm2014_vm0, %v1173_v32, %v491_v61  ;;  %v1151_v46 = vand.u32 2147483647, %v489_v29  ;;  %v1154_v47 = vcvt.s32.f32 %v1153_v37 }
 0x14c   :  { %v1673_v44 = vtrunc.f32 %v775_v36  ;;  %v620_v45 = vadd.f32 %v1174_v42, %v1869_v12  ;;  %v1429_v49 = vor.u32 %v1428_v15, %v1427_v43  ;;  %v1156_v52 = vand.u32 2147483648, %v489_v29 }
 0x14d   :  { %v1610_v40 = vcvt.f32.s32 %v1609_v41  ;;  %v521_v53 = vadd.f32 %v1861_v62, %v450_v34  ;;  %v1155_v56 = vand.u32 2147483647, %v1154_v47  ;;  %v492_v25 = vadd.f32 %v1861_v62, %v421_v38  ;;  %v1053_v38 = vpop.f32.mrf.mxu1 }
 0x14e   :  { %v1674_v54 = vcvt.f32.s32 %v1673_v44  ;;  %v684_v55 = vmax.f32 %v620_v45, 0.0  ;;  %v1430_v58 = vsel %vm2020_vm1, %v1429_v49, %v2006_v63  ;;  %v453_v50 = vmul.f32 %v1050_v48, %v1856_v60 }
 0x14f   :  { %v869_v57 = vpack.c.b16 %v1610_v40, %v1989_v31  ;;  %v1409_v59 = vcvt.f32.s32 %v521_v53  ;;  %v652_v2 = vadd.f32 %v1430_v58, %v1869_v12  ;;  %v1157_v3 = vor.u32 %v1156_v52, %v1155_v56 }
 0x150   :  { %v893_v61 = vpack.c.b16 %v1674_v54, %v1672_v11  ;;  %v748_v35 = vmin.f32 %v684_v55, 255.0  ;;  %vm1152_vm2 = vcmp.lt.f32.partialorder %v1151_v46, 8388608.0  ;;  %v1407_v7 = vand.u32 2147483647, %v521_v53 }
 0x151   :  { %v871_v4 = vpack.c.b8 %v870_v21, %v869_v57  ;;  %v1410_v1 = vcvt.s32.f32 %v1409_v59  ;;  %v716_v5 = vmax.f32 %v652_v2, 0.0  ;;  %v1158_v6 = vsel %vm1152_vm2, %v1157_v3, %v489_v29 }
 0x152   :  { %v895_v0 = vpack.c.b8 %v894_v39, %v893_v61  ;;  %v618_v31 = vadd.f32 %v1158_v6, %v1869_v12  ;;  %v1412_v63 = vand.u32 2147483648, %v521_v53  ;;  %v1177_v9 = vcvt.f32.s32 %v492_v25 }
 0x153   :  { %915 = vst [vmem:[#allocation9 + $0x8] sm:$0xff] %v871_v4  ;;  %v1411_v8 = vand.u32 2147483647, %v1410_v1  ;;  %v1619_v11 = vtrunc.f32 %v748_v35  ;;  %v780_v14 = vmin.f32 %v716_v5, 255.0  ;;  %v1175_v16 = vand.u32 2147483647, %v492_v25 }
 0x154   :  { %923 = vst [vmem:[#allocation9 + $0x48] sm:$0xff] %v895_v0  ;;  %v524_v51 = vadd.f32 %v1861_v62, %v453_v50  ;;  %v682_v17 = vmax.f32 %v618_v31, 0.0  ;;  %v1178_v19 = vcvt.s32.f32 %v1177_v9  ;;  %vm1408_vm3 = vcmp.lt.f32.partialorder %v1407_v7, 8388608.0 }
 0x155   :  { %v1413_v18 = vor.u32 %v1412_v63, %v1411_v8  ;;  %v1683_v21 = vtrunc.f32 %v780_v14  ;;  %v1180_v10 = vand.u32 2147483648, %v492_v25  ;;  %v419_v27 = vmul.f32 %v1856_v60, %v187_v13 }
 0x156   :  { %v1433_v22 = vcvt.f32.s32 %v524_v51  ;;  %v746_v23 = vmin.f32 %v682_v17, 255.0  ;;  %v1179_v26 = vand.u32 2147483647, %v1178_v19  ;;  %v2043_v29 = vcvt.f32.s32 %v1619_v11  ;;  %v200_v19 = vpop.f32.mrf.mxu0 }
 0x157   :  { %v1414_v24 = vsel %vm1408_vm3, %v1413_v18, %v521_v53  ;;  %vm2046_vm4 = vcmp.lt.f32.partialorder %v1175_v16, 8388608.0  ;;  %v1431_v36 = vand.u32 2147483647, %v524_v51  ;;  %v490_v15 = vadd.f32 %v1861_v62, %v419_v27 }
 0x158   :  { %v650_v30 = vadd.f32 %v1414_v24, %v1869_v12  ;;  %v1434_v33 = vcvt.s32.f32 %v1433_v22  ;;  %v1181_v34 = vor.u32 %v1180_v10, %v1179_v26  ;;  %v451_v37 = vmul.f32 %v1856_v60, %v315_v20  ;;  %v328_v20 = vpop.f32.mrf.mxu1 }
 0x159   :  { %v1436_v42 = vand.u32 2147483648, %v524_v51  ;;  %v424_v43 = vmul.f32 %v1021_v28, %v1856_v60  ;;  %v2053_v44 = vcvt.f32.s32 %v1683_v21  ;;  %v1615_v45 = vtrunc.f32 %v746_v23 }
 0x15a   :  { %v714_v39 = vmax.f32 %v650_v30, 0.0  ;;  %v1435_v41 = vand.u32 2147483647, %v1434_v33  ;;  %v1182_v46 = vsel %vm2046_vm4, %v1181_v34, %v492_v25  ;;  %v1161_v47 = vcvt.f32.s32 %v490_v15 }
 0x15b   :  { %v621_v40 = vadd.f32 %v1182_v46, %v1869_v12  ;;  %v456_v52 = vmul.f32 %v1053_v38, %v1856_v60  ;;  %vm1432_vm5 = vcmp.lt.f32.partialorder %v1431_v36, 8388608.0  ;;  %v1159_v53 = vand.u32 2147483647, %v490_v15 }
 0x15c   :  { %v778_v48 = vmin.f32 %v714_v39, 255.0  ;;  %v1437_v49 = vor.u32 %v1436_v42, %v1435_v41  ;;  %v1162_v54 = vcvt.s32.f32 %v1161_v47  ;;  %v522_v55 = vadd.f32 %v1861_v62, %v451_v37 }
 0x15d   :  { %v685_v57 = vmax.f32 %v621_v40, 0.0  ;;  %v495_v59 = vadd.f32 %v1861_v62, %v424_v43  ;;  %v1164_v61 = vand.u32 2147483648, %v490_v15  ;;  %v2062_v2 = vcvt.f32.s32 %v1615_v45  ;;  %v1022_v43 = vpop.f32.mrf.mxu0 }
 0x15e   :  { %v1679_v56 = vtrunc.f32 %v778_v48  ;;  %v1438_v58 = vsel %vm1432_vm5, %v1437_v49, %v524_v51  ;;  %v1163_v25 = vand.u32 2147483647, %v1162_v54  ;;  %v1417_v35 = vcvt.f32.s32 %v522_v55 }
 0x15f   :  { %v653_v50 = vadd.f32 %v1438_v58, %v1869_v12  ;;  %v749_v3 = vmin.f32 %v685_v57, 255.0  ;;  %v1415_v4 = vand.u32 2147483647, %v522_v55  ;;  %v527_v1 = vadd.f32 %v1861_v62, %v456_v52  ;;  %v203_v51 = vpop.f32.mrf.mxu0 }
 0x160   :  { %vm1160_vm6 = vcmp.lt.f32.partialorder %v1159_v53, 8388608.0  ;;  %v1165_v5 = vor.u32 %v1164_v61, %v1163_v25  ;;  %v1418_v6 = vcvt.s32.f32 %v1417_v35  ;;  %v2065_v7 = vcvt.f32.s32 %v1679_v56 }
 0x161   :  { %v717_v0 = vmax.f32 %v653_v50, 0.0  ;;  %v1621_v31 = vtrunc.f32 %v749_v3  ;;  %v1420_v8 = vand.u32 2147483648, %v522_v55  ;;  %v1201_v63 = vcvt.f32.s32 %v495_v59  ;;  %v1054_v3 = vpop.f32.mrf.mxu1 }
 0x162   :  { %v1166_v13 = vsel %vm1160_vm6, %v1165_v5, %v490_v15  ;;  %v1419_v11 = vand.u32 2147483647, %v1418_v6  ;;  %v1199_v14 = vand.u32 2147483647, %v495_v59  ;;  %vm2068_vm7 = vcmp.lt.f32.partialorder %v1415_v4, 8388608.0 }
 0x163   :  { %v781_v9 = vmin.f32 %v717_v0, 255.0  ;;  %v619_v16 = vadd.f32 %v1166_v13, %v1869_v12  ;;  %v1202_v17 = vcvt.s32.f32 %v1201_v63  ;;  %v1457_v18 = vcvt.f32.s32 %v527_v1 }
 0x164   :  { %v1421_v10 = vor.u32 %v1420_v8, %v1419_v11  ;;  %v1204_v22 = vand.u32 2147483648, %v495_v59  ;;  %v1455_v23 = vand.u32 2147483647, %v527_v1  ;;  %v1622_v24 = vcvt.f32.s32 %v1621_v31 }
 0x165   :  { %v1685_v21 = vtrunc.f32 %v781_v9  ;;  %v683_v26 = vmax.f32 %v619_v16, 0.0  ;;  %v1203_v27 = vand.u32 2147483647, %v1202_v17  ;;  %v1458_v28 = vcvt.s32.f32 %v1457_v18 }
 0x166   :  { %v1422_v30 = vsel %vm2068_vm7, %v1421_v10, %v522_v55  ;;  %v1460_v32 = vand.u32 2147483648, %v527_v1  ;;  %v422_v33 = vmul.f32 %v1856_v60, %v200_v19  ;;  %v454_v34 = vmul.f32 %v1856_v60, %v328_v20  ;;  %v331_v19 = vpop.f32.mrf.mxu1 }
 0x167   :  { %v747_v36 = vmin.f32 %v683_v26, 255.0  ;;  %v651_v15 = vadd.f32 %v1422_v30, %v1869_v12  ;;  %v1205_v37 = vor.u32 %v1204_v22, %v1203_v27  ;;  %v1459_v38 = vand.u32 2147483647, %v1458_v28 }
 0x168   :  { %v1686_v39 = vcvt.f32.s32 %v1685_v21  ;;  %vm1200_vm8 = vcmp.lt.f32.partialorder %v1199_v14, 8388608.0  ;;  %v493_v41 = vadd.f32 %v1861_v62, %v422_v33  ;;  %v2079_v42 = vadd.f32 %v1861_v62, %v454_v34 }
 0x169   :  { %v1617_v45 = vtrunc.f32 %v747_v36  ;;  %v715_v46 = vmax.f32 %v651_v15, 0.0  ;;  %v1206_v47 = vsel %vm1200_vm8, %v1205_v37, %v495_v59  ;;  %v1461_v48 = vor.u32 %v1460_v32, %v1459_v38  ;;  %v1025_v36 = vpop.f32.mrf.mxu0 }
 0x16a   :  { %v873_v40 = vpack.c.b16 %v1622_v24, %v2043_v29  ;;  %v624_v49 = vadd.f32 %v1206_v47, %v1869_v12  ;;  %vm1456_vm9 = vcmp.lt.f32.partialorder %v1455_v23, 8388608.0  ;;  %v1185_v52 = vcvt.f32.s32 %v493_v41 }
 0x16b   :  { %v1618_v53 = vcvt.f32.s32 %v1617_v45  ;;  %v779_v54 = vmin.f32 %v715_v46, 255.0  ;;  %v1462_v55 = vsel %vm1456_vm9, %v1461_v48, %v527_v1  ;;  %v425_v56 = vmul.f32 %v1022_v43, %v1856_v60 }
 0x16c   :  { %v688_v57 = vmax.f32 %v624_v49, 0.0  ;;  %v656_v58 = vadd.f32 %v1462_v55, %v1869_v12  ;;  %v1183_v50 = vand.u32 2147483647, %v493_v41  ;;  %v1186_v25 = vcvt.s32.f32 %v1185_v52 }
 0x16d   :  { %v897_v61 = vpack.c.b16 %v1686_v39, %v2053_v44  ;;  %v872_v59 = vpack.c.b16 %v1618_v53, %v2062_v2  ;;  %v1681_v35 = vtrunc.f32 %v779_v54  ;;  %v1441_v29 = vcvt.f32.s32 %v2079_v42 }
 0x16e   :  { %v720_v4 = vmax.f32 %v656_v58, 0.0  ;;  %v1187_v0 = vand.u32 2147483647, %v1186_v25  ;;  %v1188_v5 = vand.u32 2147483648, %v493_v41  ;;  %v1439_v1 = vand.u32 2147483647, %v2079_v42 }
 0x16f   :  { %v874_v6 = vpack.c.b8 %v873_v40, %v872_v59  ;;  %v1682_v31 = vcvt.f32.s32 %v1681_v35  ;;  %v1442_v8 = vcvt.s32.f32 %v1441_v29  ;;  %v496_v63 = vadd.f32 %v1861_v62, %v425_v56 }
 0x170   :  { %v752_v9 = vmin.f32 %v688_v57, 255.0  ;;  %vm1184_vm10 = vcmp.lt.f32.partialorder %v1183_v50, 8388608.0  ;;  %v1189_v13 = vor.u32 %v1188_v5, %v1187_v0  ;;  %v457_v44 = vmul.f32 %v1054_v3, %v1856_v60  ;;  %v1057_v57 = vpop.f32.mrf.mxu1 }
 0x171   :  { %916 = vst [vmem:[#allocation9 + $0x10] sm:$0xff] %v874_v6  ;;  %v896_v2 = vpack.c.b16 %v1682_v31, %v2065_v7  ;;  %v1443_v11 = vand.u32 2147483647, %v1442_v8  ;;  %v1444_v14 = vand.u32 2147483648, %v2079_v42  ;;  %v1209_v16 = vcvt.f32.s32 %v496_v63 }
 0x172   :  { %v784_v17 = vmin.f32 %v720_v4, 255.0  ;;  %v1190_v18 = vsel %vm1184_vm10, %v1189_v13, %v493_v41  ;;  %vm1440_vm11 = vcmp.lt.f32.partialorder %v1439_v1, 8388608.0  ;;  %v528_v23 = vadd.f32 %v1861_v62, %v457_v44  ;;  %v2115_v13 = vld [vmem:[%s2377_s3] ss:$0 sm:$0xff]  ;;  %s1815_s3 = smov [#allocation9]  }
 0x173   :  { %v898_v20 = vpack.c.b8 %v897_v61, %v896_v2  ;;  %v622_v21 = vadd.f32 %v1190_v18, %v1869_v12  ;;  %v1445_v10 = vor.u32 %v1444_v14, %v1443_v11  ;;  %v1210_v22 = vcvt.s32.f32 %v1209_v16  ;;  %s935_s7 = sshll.u32 %s1815_s3, 4  ;;  %s936_s7 = int_to_ptr.vmem [resolvable:$true] %s935_s7 }
 0x174   :  { %v423_v24 = vmul.f32 %v1856_v60, %v203_v51  ;;  %v1627_v7 = vtrunc.f32 %v752_v9  ;;  %v1207_v27 = vand.u32 2147483647, %v496_v63  ;;  %v455_v28 = vmul.f32 %v1856_v60, %v331_v19  ;;  %s1782_s8 = scalar_lea.vmem %s936_s7, 2048  ;;  %p1787_p11 = scmp.lt.s32.totalorder %s936_s7, %s936_s7 }
 0x175   :  { %924 = vst [vmem:[#allocation9 + $0x50] sm:$0xff] %v898_v20  ;;  %v1446_v26 = vsel %vm1440_vm11, %v1445_v10, %v2079_v42  ;;  %v1691_v30 = vtrunc.f32 %v784_v17  ;;  %v1211_v32 = vand.u32 2147483647, %v1210_v22  ;;  %v1212_v33 = vand.u32 2147483648, %v496_v63  ;;  %v216_v10 = vpop.f32.mrf.mxu0  ;;  %v344_v22 = vpop.f32.mrf.mxu1  ;;  %p1783_p10 = scmp.ne.s32.totalorder %s936_s7, %s1782_s8  ;;  %p1788_p12 = scmp.lt.s32.totalorder %s1782_s8, %s1782_s8 }
 0x176   :  { %v1465_v34 = vcvt.f32.s32 %v528_v23  ;;  %v686_v15 = vmax.f32 %v622_v21, 0.0  ;;  %v654_v37 = vadd.f32 %v1446_v26, %v1869_v12  ;;  %v494_v38 = vadd.f32 %v1861_v62, %v423_v24 }
 0x177   :  { %v1213_v39 = vor.u32 %v1212_v33, %v1211_v32  ;;  %v1463_v41 = vand.u32 2147483647, %v528_v23  ;;  %v526_v45 = vadd.f32 %v1861_v62, %v455_v28  ;;  %v2101_v46 = vcvt.f32.s32 %v1627_v7  ;;  %p1789_p13 = por %p1788_p12, %p1787_p11 }
 0x178   :  { %v1466_v43 = vcvt.s32.f32 %v1465_v34  ;;  %vm1208_vm12 = vcmp.lt.f32.partialorder %v1207_v27, 8388608.0  ;;  %v1193_v42 = vcvt.f32.s32 %v494_v38  ;;  %v428_v47 = vmul.f32 %v1025_v36, %v1856_v60 }
 0x179   :  { %v2104_v48 = vcvt.f32.s32 %v1691_v30  ;;  %v1214_v40 = vsel %vm1208_vm12, %v1213_v39, %v496_v63  ;;  %v1468_v52 = vand.u32 2147483648, %v528_v23  ;;  %v2106_v53 = vmin.f32 %v686_v15, 255.0  ;;  %p1790_p0 = pnand %p1789_p13, %p1783_p10 }
 0x17a   :  { %v1467_v49 = vand.u32 2147483647, %v1466_v43  ;;  %v625_v54 = vadd.f32 %v1214_v40, %v1869_v12  ;;  %v1191_v55 = vand.u32 2147483647, %v494_v38  ;;  %v1194_v56 = vcvt.s32.f32 %v1193_v42 }
 0x17b   :  { %v718_v58 = vmax.f32 %v654_v37, 0.0  ;;  %vm1464_vm13 = vcmp.lt.f32.partialorder %v1463_v41, 8388608.0  ;;  %v1449_v25 = vcvt.f32.s32 %v526_v45  ;;  %v1196_v35 = vand.u32 2147483648, %v494_v38 }
 0x17c   :  { %v1469_v50 = vor.u32 %v1468_v52, %v1467_v49  ;;  %v689_v61 = vmax.f32 %v625_v54, 0.0  ;;  %v1195_v59 = vand.u32 2147483647, %v1194_v56  ;;  %v499_v29 = vadd.f32 %v1861_v62, %v428_v47  ;;  %v1026_v47 = vpop.f32.mrf.mxu0 }
 0x17d   :  { %v1447_v4 = vand.u32 2147483647, %v526_v45  ;;  %v1450_v0 = vcvt.s32.f32 %v1449_v25  ;;  %v460_v5 = vmul.f32 %v1057_v57, %v1856_v60  ;;  %vm1192_vm14 = vcmp.lt.f32.partialorder %v1191_v55, 8388608.0 }
 0x17e   :  { %v1470_v3 = vsel %vm1464_vm13, %v1469_v50, %v528_v23  ;;  %v1197_v6 = vor.u32 %v1196_v35, %v1195_v59  ;;  %v1452_v31 = vand.u32 2147483648, %v526_v45  ;;  %v753_v8 = vmin.f32 %v689_v61, 255.0 }
 0x17f   :  { %v657_v1 = vadd.f32 %v1470_v3, %v1869_v12  ;;  %v1451_v63 = vand.u32 2147483647, %v1450_v0  ;;  %v1233_v9 = vcvt.f32.s32 %v499_v29  ;;  %v2118_v62 = vadd.f32 %v2115_v13, %v460_v5 }
 0x180   :  { %v1623_v44 = vtrunc.f32 %v2106_v53  ;;  %v782_v2 = vmin.f32 %v718_v58, 255.0  ;;  %v1198_v14 = vsel %vm1192_vm14, %v1197_v6, %v494_v38  ;;  %vm1448_vm15 = vcmp.lt.f32.partialorder %v1447_v4, 8388608.0  ;;  %v1058_v6 = vpop.f32.mrf.mxu1 }
 0x181   :  { %v721_v11 = vmax.f32 %v657_v1, 0.0  ;;  %v623_v16 = vadd.f32 %v1198_v14, %v1869_v12  ;;  %v1453_v51 = vor.u32 %v1452_v31, %v1451_v63  ;;  %v1234_v17 = vcvt.s32.f32 %v1233_v9  ;;  %v219_v31 = vpop.f32.mrf.mxu0 }
 0x182   :  { %v1231_v19 = vand.u32 2147483647, %v499_v29  ;;  %v1236_v20 = vand.u32 2147483648, %v499_v29  ;;  %v1489_v21 = vcvt.f32.s32 %v2118_v62  ;;  %v1629_v23 = vtrunc.f32 %v753_v8 }
 0x183   :  { %v785_v18 = vmin.f32 %v721_v11, 255.0  ;;  %v687_v24 = vmax.f32 %v623_v16, 0.0  ;;  %v1454_v7 = vsel %vm1448_vm15, %v1453_v51, %v526_v45  ;;  %v1235_v26 = vand.u32 2147483647, %v1234_v17 }
 0x184   :  { %v1687_v27 = vtrunc.f32 %v782_v2  ;;  %v655_v30 = vadd.f32 %v1454_v7, %v1869_v12  ;;  %v1490_v32 = vcvt.s32.f32 %v1489_v21  ;;  %v426_v36 = vmul.f32 %v1856_v60, %v216_v10 }
 0x185   :  { %v1693_v28 = vtrunc.f32 %v785_v18  ;;  %v751_v33 = vmin.f32 %v687_v24, 255.0  ;;  %v1237_v34 = vor.u32 %v1236_v20, %v1235_v26  ;;  %v458_v15 = vmul.f32 %v1856_v60, %v344_v22 }
 0x186   :  { %v719_v37 = vmax.f32 %v655_v30, 0.0  ;;  %vm1232_vm0 = vcmp.lt.f32.partialorder %v1231_v19, 8388608.0  ;;  %v1487_v38 = vand.u32 2147483647, %v2118_v62  ;;  %v1491_v39 = vand.u32 2147483647, %v1490_v32 }
 0x187   :  { %v1630_v41 = vcvt.f32.s32 %v1629_v23  ;;  %v1625_v43 = vtrunc.f32 %v751_v33  ;;  %v1238_v45 = vsel %vm1232_vm0, %v1237_v34, %v499_v29  ;;  %v497_v42 = vadd.f32 %v2115_v13, %v426_v36  ;;  %v347_v23 = vpop.f32.mrf.mxu1 }
 0x188   :  { %v1694_v40 = vcvt.f32.s32 %v1693_v28  ;;  %v783_v49 = vmin.f32 %v719_v37, 255.0  ;;  %v1492_v52 = vand.u32 2147483648, %v2118_v62  ;;  %v529_v53 = vadd.f32 %v2115_v13, %v458_v15 }
 0x189   :  { %v1624_v54 = vcvt.f32.s32 %v1623_v44  ;;  %v1626_v55 = vcvt.f32.s32 %v1625_v43  ;;  %v628_v56 = vadd.f32 %v1238_v45, %v1869_v12  ;;  %v1217_v57 = vcvt.f32.s32 %v497_v42 }
 0x18a   :  { %v1688_v58 = vcvt.f32.s32 %v1687_v27  ;;  %v1689_v50 = vtrunc.f32 %v783_v49  ;;  %v1493_v25 = vor.u32 %v1492_v52, %v1491_v39  ;;  %v429_v61 = vmul.f32 %v1026_v47, %v1856_v60  ;;  %v1029_v47 = vpop.f32.mrf.mxu0 }
 0x18b   :  { %v876_v59 = vpack.c.b16 %v1630_v41, %v2101_v46  ;;  %v875_v35 = vpack.c.b16 %v1626_v55, %v1624_v54  ;;  %vm2133_vm1 = vcmp.lt.f32.partialorder %v1487_v38, 8388608.0  ;;  %v1218_v3 = vcvt.s32.f32 %v1217_v57  ;;  %v1061_v57 = vpop.f32.mrf.mxu1 }
 0x18c   :  { %v900_v4 = vpack.c.b16 %v1694_v40, %v2104_v48  ;;  %v1690_v0 = vcvt.f32.s32 %v1689_v50  ;;  %v1215_v5 = vand.u32 2147483647, %v497_v42  ;;  %v1473_v1 = vcvt.f32.s32 %v529_v53 }
 0x18d   :  { %v877_v8 = vpack.c.b8 %v876_v59, %v875_v35  ;;  %v692_v63 = vmax.f32 %v628_v56, 0.0  ;;  %v1219_v9 = vand.u32 2147483647, %v1218_v3  ;;  %v1220_v44 = vand.u32 2147483648, %v497_v42 }
 0x18e   :  { %v899_v2 = vpack.c.b16 %v1690_v0, %v1688_v58  ;;  %v1494_v46 = vsel %vm2133_vm1, %v1493_v25, %v2118_v62  ;;  %v1474_v11 = vcvt.s32.f32 %v1473_v1  ;;  %v500_v14 = vadd.f32 %v2115_v13, %v429_v61 }
 0x18f   :  { %917 = vst [vmem:[#allocation9 + $0x18] sm:$0xff] %v877_v8  ;;  %v1221_v16 = vor.u32 %v1220_v44, %v1219_v9  ;;  %v1471_v48 = vand.u32 2147483647, %v529_v53  ;;  %v461_v51 = vmul.f32 %v1058_v6, %v1856_v60  ;;  %v427_v17 = vmul.f32 %v1856_v60, %v219_v31 }
 0x190   :  { %v901_v18 = vpack.c.b8 %v900_v4, %v899_v2  ;;  %vm1216_vm2 = vcmp.lt.f32.partialorder %v1215_v5, 8388608.0  ;;  %v1475_v19 = vand.u32 2147483647, %v1474_v11  ;;  %v1476_v20 = vand.u32 2147483648, %v529_v53 }
 0x191   :  { %v660_v21 = vadd.f32 %v1494_v46, %v1869_v12  ;;  %v1222_v10 = vsel %vm1216_vm2, %v1221_v16, %v497_v42  ;;  %v1241_v22 = vcvt.f32.s32 %v500_v14  ;;  %v2145_v62 = vmin.f32 %v692_v63, 255.0  ;;  %v232_v16 = vpop.f32.mrf.mxu0 }
 0x192   :  { %925 = vst [vmem:[#allocation9 + $0x58] sm:$0xff] %v901_v18  ;;  %v626_v24 = vadd.f32 %v1222_v10, %v1869_v12  ;;  %v1477_v7 = vor.u32 %v1476_v20, %v1475_v19  ;;  %v532_v26 = vadd.f32 %v2115_v13, %v461_v51  ;;  %vm2149_vm3 = vcmp.lt.f32.partialorder %v1471_v48, 8388608.0 }
 0x193   :  { %v1239_v28 = vand.u32 2147483647, %v500_v14  ;;  %v1242_v30 = vcvt.s32.f32 %v1241_v22  ;;  %v498_v32 = vadd.f32 %v2115_v13, %v427_v17  ;;  %v459_v36 = vmul.f32 %v1856_v60, %v347_v23 }
 0x194   :  { %v1478_v33 = vsel %vm2149_vm3, %v1477_v7, %v529_v53  ;;  %v1497_v34 = vcvt.f32.s32 %v532_v26  ;;  %v690_v15 = vmax.f32 %v626_v24, 0.0  ;;  %v1244_v38 = vand.u32 2147483648, %v500_v14 }
 0x195   :  { %v1243_v37 = vand.u32 2147483647, %v1242_v30  ;;  %v1495_v39 = vand.u32 2147483647, %v532_v26  ;;  %v1635_v41 = vtrunc.f32 %v2145_v62  ;;  %v724_v43 = vmax.f32 %v660_v21, 0.0 }
 0x196   :  { %v1498_v45 = vcvt.s32.f32 %v1497_v34  ;;  %v1225_v42 = vcvt.f32.s32 %v498_v32  ;;  %v658_v40 = vadd.f32 %v1478_v33, %v1869_v12  ;;  %vm1240_vm4 = vcmp.lt.f32.partialorder %v1239_v28, 8388608.0 }
 0x197   :  { %v1245_v49 = vor.u32 %v1244_v38, %v1243_v37  ;;  %v1500_v52 = vand.u32 2147483648, %v532_v26  ;;  %v1223_v53 = vand.u32 2147483647, %v498_v32  ;;  %v530_v56 = vadd.f32 %v2115_v13, %v459_v36  ;;  %v360_v36 = vpop.f32.mrf.mxu1 }
 0x198   :  { %v1499_v54 = vand.u32 2147483647, %v1498_v45  ;;  %v1226_v55 = vcvt.s32.f32 %v1225_v42  ;;  %v754_v58 = vmin.f32 %v690_v15, 255.0  ;;  %vm1496_vm5 = vcmp.lt.f32.partialorder %v1495_v39, 8388608.0 }
 0x199   :  { %v1246_v50 = vsel %vm1240_vm4, %v1245_v49, %v500_v14  ;;  %v432_v25 = vmul.f32 %v1029_v47, %v1856_v60  ;;  %v1228_v29 = vand.u32 2147483648, %v498_v32  ;;  %v722_v3 = vmax.f32 %v658_v40, 0.0 }
 0x19a   :  { %v629_v61 = vadd.f32 %v1246_v50, %v1869_v12  ;;  %v1501_v59 = vor.u32 %v1500_v52, %v1499_v54  ;;  %v1227_v35 = vand.u32 2147483647, %v1226_v55  ;;  %v1479_v4 = vand.u32 2147483647, %v530_v56 }
 0x19b   :  { %v1481_v0 = vcvt.f32.s32 %v530_v56  ;;  %v464_v5 = vmul.f32 %v1061_v57, %v1856_v60  ;;  %v503_v8 = vadd.f32 %v2115_v13, %v432_v25  ;;  %v788_v63 = vmin.f32 %v724_v43, 255.0  ;;  %v1030_v43 = vpop.f32.mrf.mxu0 }
 0x19c   :  { %v693_v1 = vmax.f32 %v629_v61, 0.0  ;;  %v1502_v6 = vsel %vm1496_vm5, %v1501_v59, %v532_v26  ;;  %v1229_v31 = vor.u32 %v1228_v29, %v1227_v35  ;;  %vm1224_vm6 = vcmp.lt.f32.partialorder %v1223_v53, 8388608.0 }
 0x19d   :  { %v661_v9 = vadd.f32 %v1502_v6, %v1869_v12  ;;  %v1482_v44 = vcvt.s32.f32 %v1481_v0  ;;  %v1631_v2 = vtrunc.f32 %v754_v58  ;;  %v1265_v14 = vcvt.f32.s32 %v503_v8 }
 0x19e   :  { %v757_v46 = vmin.f32 %v693_v1, 255.0  ;;  %v1230_v11 = vsel %vm1224_vm6, %v1229_v31, %v498_v32  ;;  %v1484_v18 = vand.u32 2147483648, %v530_v56  ;;  %v786_v19 = vmin.f32 %v722_v3, 255.0 }
 0x19f   :  { %v725_v48 = vmax.f32 %v661_v9, 0.0  ;;  %v627_v51 = vadd.f32 %v1230_v11, %v1869_v12  ;;  %v1483_v17 = vand.u32 2147483647, %v1482_v44  ;;  %vm2166_vm7 = vcmp.lt.f32.partialorder %v1479_v4, 8388608.0  ;;  %v1062_v9 = vpop.f32.mrf.mxu1 }
 0x1a0   :  { %v1266_v21 = vcvt.s32.f32 %v1265_v14  ;;  %v2171_v10 = vadd.f32 %v2115_v13, %v464_v5  ;;  %v1637_v22 = vtrunc.f32 %v757_v46  ;;  %v430_v24 = vmul.f32 %v1856_v60, %v232_v16 }
 0x1a1   :  { %v691_v23 = vmax.f32 %v627_v51, 0.0  ;;  %v1485_v62 = vor.u32 %v1484_v18, %v1483_v17  ;;  %v789_v7 = vmin.f32 %v725_v48, 255.0  ;;  %v1263_v26 = vand.u32 2147483647, %v503_v8  ;;  %v235_v51 = vpop.f32.mrf.mxu0 }
 0x1a2   :  { %v1267_v27 = vand.u32 2147483647, %v1266_v21  ;;  %v1268_v28 = vand.u32 2147483648, %v503_v8  ;;  %v1636_v30 = vcvt.f32.s32 %v1635_v41  ;;  %v1521_v34 = vcvt.f32.s32 %v2171_v10 }
 0x1a3   :  { %v755_v32 = vmin.f32 %v691_v23, 255.0  ;;  %v1486_v33 = vsel %vm2166_vm7, %v1485_v62, %v530_v56  ;;  %v1699_v15 = vtrunc.f32 %v788_v63  ;;  %v1695_v37 = vtrunc.f32 %v786_v19 }
 0x1a4   :  { %v659_v38 = vadd.f32 %v1486_v33, %v1869_v12  ;;  %v1269_v39 = vor.u32 %v1268_v28, %v1267_v27  ;;  %v1632_v45 = vcvt.f32.s32 %v1631_v2  ;;  %v1638_v42 = vcvt.f32.s32 %v1637_v22 }
 0x1a5   :  { %v1633_v47 = vtrunc.f32 %v755_v32  ;;  %v501_v40 = vadd.f32 %v2115_v13, %v430_v24  ;;  %v1701_v49 = vtrunc.f32 %v789_v7  ;;  %vm2179_vm8 = vcmp.lt.f32.partialorder %v1263_v26, 8388608.0  ;;  %v363_v24 = vpop.f32.mrf.mxu1 }
 0x1a6   :  { %v723_v41 = vmax.f32 %v659_v38, 0.0  ;;  %v462_v54 = vmul.f32 %v1856_v60, %v360_v36  ;;  %v1270_v55 = vsel %vm2179_vm8, %v1269_v39, %v503_v8  ;;  %v1522_v56 = vcvt.s32.f32 %v1521_v34  ;;  %v1033_v36 = vpop.f32.mrf.mxu0 }
 0x1a7   :  { %v1634_v53 = vcvt.f32.s32 %v1633_v47  ;;  %v433_v57 = vmul.f32 %v1030_v43, %v1856_v60  ;;  %v1700_v58 = vcvt.f32.s32 %v1699_v15  ;;  %v1696_v50 = vcvt.f32.s32 %v1695_v37 }
 0x1a8   :  { %v787_v25 = vmin.f32 %v723_v41, 255.0  ;;  %v1249_v61 = vcvt.f32.s32 %v501_v40  ;;  %v879_v59 = vpack.c.b16 %v1638_v42, %v1636_v30  ;;  %v1519_v29 = vand.u32 2147483647, %v2171_v10 }
 0x1a9   :  { %v878_v35 = vpack.c.b16 %v1634_v53, %v1632_v45  ;;  %v533_v3 = vadd.f32 %v2115_v13, %v462_v54  ;;  %v1702_v4 = vcvt.f32.s32 %v1701_v49  ;;  %v632_v5 = vadd.f32 %v1270_v55, %v1869_v12 }
 0x1aa   :  { %v1697_v0 = vtrunc.f32 %v787_v25  ;;  %v1250_v1 = vcvt.s32.f32 %v1249_v61  ;;  %v1523_v31 = vand.u32 2147483647, %v1522_v56  ;;  %v1247_v8 = vand.u32 2147483647, %v501_v40 }
 0x1ab   :  { %v880_v6 = vpack.c.b8 %v879_v59, %v878_v35  ;;  %v504_v63 = vadd.f32 %v2115_v13, %v433_v57  ;;  %v1252_v46 = vand.u32 2147483648, %v501_v40  ;;  %v1505_v11 = vcvt.f32.s32 %v533_v3 }
 0x1ac   :  { %v1698_v44 = vcvt.f32.s32 %v1697_v0  ;;  %v1251_v2 = vand.u32 2147483647, %v1250_v1  ;;  %vm2191_vm9 = vcmp.lt.f32.partialorder %v1519_v29, 8388608.0  ;;  %v1524_v16 = vand.u32 2147483648, %v2171_v10 }
 0x1ad   :  { %918 = vst [vmem:[#allocation9 + $0x20] sm:$0xff] %v880_v6  ;;  %v1503_v48 = vand.u32 2147483647, %v533_v3  ;;  %v903_v17 = vpack.c.b16 %v1702_v4, %v1700_v58  ;;  %v1506_v20 = vcvt.s32.f32 %v1505_v11  ;;  %v696_v21 = vmax.f32 %v632_v5, 0.0 }
 0x1ae   :  { %v902_v18 = vpack.c.b16 %v1698_v44, %v1696_v50  ;;  %v1253_v19 = vor.u32 %v1252_v46, %v1251_v2  ;;  %v1525_v22 = vor.u32 %v1524_v16, %v1523_v31  ;;  %vm2196_vm10 = vcmp.lt.f32.partialorder %v1247_v8, 8388608.0 }
 0x1af   :  { %v1273_v62 = vcvt.f32.s32 %v504_v63  ;;  %v1507_v27 = vand.u32 2147483647, %v1506_v20  ;;  %v1508_v28 = vand.u32 2147483648, %v533_v3  ;;  %vm2202_vm11 = vcmp.lt.f32.partialorder %v1503_v48, 8388608.0 }
 0x1b0   :  { %v904_v7 = vpack.c.b8 %v903_v17, %v902_v18  ;;  %v1254_v26 = vsel %vm2196_vm10, %v1253_v19, %v501_v40  ;;  %v465_v33 = vmul.f32 %v1062_v9, %v1856_v60  ;;  %v431_v34 = vmul.f32 %v1856_v60, %v235_v51  ;;  %v248_v17 = vpop.f32.mrf.mxu0 }
 0x1b1   :  { %v1274_v32 = vcvt.s32.f32 %v1273_v62  ;;  %v1509_v15 = vor.u32 %v1508_v28, %v1507_v27  ;;  %v1271_v37 = vand.u32 2147483647, %v504_v63  ;;  %v1276_v38 = vand.u32 2147483648, %v504_v63 }
 0x1b2   :  { %926 = vst [vmem:[#allocation9 + $0x60] sm:$0xff] %v904_v7  ;;  %v463_v39 = vmul.f32 %v1856_v60, %v363_v24  ;;  %v630_v43 = vadd.f32 %v1254_v26, %v1869_v12  ;;  %v536_v42 = vadd.f32 %v2115_v13, %v465_v33  ;;  %v502_v47 = vadd.f32 %v2115_v13, %v431_v34 }
 0x1b3   :  { %v1275_v45 = vand.u32 2147483647, %v1274_v32  ;;  %v1526_v40 = vsel %vm2191_vm9, %v1525_v22, %v2171_v10  ;;  %v1510_v49 = vsel %vm2202_vm11, %v1509_v15, %v533_v3  ;;  %v436_v41 = vmul.f32 %v1033_v36, %v1856_v60 }
 0x1b4   :  { %v760_v52 = vmin.f32 %v696_v21, 255.0  ;;  %vm1272_vm12 = vcmp.lt.f32.partialorder %v1271_v37, 8388608.0  ;;  %v1529_v53 = vcvt.f32.s32 %v536_v42  ;;  %v1257_v55 = vcvt.f32.s32 %v502_v47 }
 0x1b5   :  { %v1277_v54 = vor.u32 %v1276_v38, %v1275_v45  ;;  %v534_v56 = vadd.f32 %v2115_v13, %v463_v39  ;;  %v664_v57 = vadd.f32 %v1526_v40, %v1869_v12  ;;  %v694_v58 = vmax.f32 %v630_v43, 0.0 }
 0x1b6   :  { %v662_v50 = vadd.f32 %v1510_v49, %v1869_v12  ;;  %v1530_v61 = vcvt.s32.f32 %v1529_v53  ;;  %v1258_v59 = vcvt.s32.f32 %v1257_v55  ;;  %v2223_v35 = vadd.f32 %v2115_v13, %v436_v41 }
 0x1b7   :  { %v1278_v25 = vsel %vm1272_vm12, %v1277_v54, %v504_v63  ;;  %v1527_v29 = vand.u32 2147483647, %v536_v42  ;;  %v1532_v3 = vand.u32 2147483648, %v536_v42  ;;  %v1255_v4 = vand.u32 2147483647, %v502_v47  ;;  %v1065_v63 = vpop.f32.mrf.mxu1 }
 0x1b8   :  { %v633_v10 = vadd.f32 %v1278_v25, %v1869_v12  ;;  %v1260_v0 = vand.u32 2147483648, %v502_v47  ;;  %v1531_v1 = vand.u32 2147483647, %v1530_v61  ;;  %v1259_v6 = vand.u32 2147483647, %v1258_v59 }
 0x1b9   :  { %v1513_v31 = vcvt.f32.s32 %v534_v56  ;;  %v1643_v8 = vtrunc.f32 %v760_v52  ;;  %v728_v9 = vmax.f32 %v664_v57, 0.0  ;;  %v758_v44 = vmin.f32 %v694_v58, 255.0  ;;  %v376_v7 = vpop.f32.mrf.mxu1 }
 0x1ba   :  { %v697_v5 = vmax.f32 %v633_v10, 0.0  ;;  %v726_v2 = vmax.f32 %v662_v50, 0.0  ;;  %v1533_v11 = vor.u32 %v1532_v3, %v1531_v1  ;;  %v1261_v14 = vor.u32 %v1260_v0, %v1259_v6 }
 0x1bb   :  { %v1514_v16 = vcvt.s32.f32 %v1513_v31  ;;  %vm1528_vm13 = vcmp.lt.f32.partialorder %v1527_v29, 8388608.0  ;;  %vm1256_vm14 = vcmp.lt.f32.partialorder %v1255_v4, 8388608.0  ;;  %v1511_v48 = vand.u32 2147483647, %v534_v56  ;;  %v1034_v31 = vpop.f32.mrf.mxu0 }
 0x1bc   :  { %v761_v46 = vmin.f32 %v697_v5, 255.0  ;;  %v1516_v51 = vand.u32 2147483648, %v534_v56  ;;  %v1534_v18 = vsel %vm1528_vm13, %v1533_v11, %v536_v42  ;;  %v1262_v19 = vsel %vm1256_vm14, %v1261_v14, %v502_v47 }
 0x1bd   :  { %v1515_v20 = vand.u32 2147483647, %v1514_v16  ;;  %v1297_v21 = vcvt.f32.s32 %v2223_v35  ;;  %v792_v22 = vmin.f32 %v728_v9, 255.0  ;;  %v665_v23 = vadd.f32 %v1534_v18, %v1869_v12 }
 0x1be   :  { %v631_v62 = vadd.f32 %v1262_v19, %v1869_v12  ;;  %v468_v24 = vmul.f32 %v1065_v63, %v1856_v60  ;;  %v1639_v26 = vtrunc.f32 %v758_v44  ;;  %v1645_v27 = vtrunc.f32 %v761_v46  ;;  %v1066_v63 = vpop.f32.mrf.mxu1 }
 0x1bf   :  { %v1517_v28 = vor.u32 %v1516_v51, %v1515_v20  ;;  %v434_v30 = vmul.f32 %v1856_v60, %v248_v17  ;;  %v729_v32 = vmax.f32 %v665_v23, 0.0  ;;  %vm1512_vm15 = vcmp.lt.f32.partialorder %v1511_v48, 8388608.0  ;;  %v251_v23 = vpop.f32.mrf.mxu0 }
 0x1c0   :  { %v695_v33 = vmax.f32 %v631_v62, 0.0  ;;  %v2231_v34 = vadd.f32 %v2115_v13, %v468_v24  ;;  %v790_v36 = vmin.f32 %v726_v2, 255.0  ;;  %v1298_v37 = vcvt.s32.f32 %v1297_v21 }
 0x1c1   :  { %v1518_v15 = vsel %vm1512_vm15, %v1517_v28, %v534_v56  ;;  %v466_v38 = vmul.f32 %v1856_v60, %v376_v7  ;;  %v793_v39 = vmin.f32 %v729_v32, 255.0  ;;  %v2236_v42 = vadd.f32 %v2115_v13, %v434_v30 }
 0x1c2   :  { %v759_v43 = vmin.f32 %v695_v33, 255.0  ;;  %v663_v45 = vadd.f32 %v1518_v15, %v1869_v12  ;;  %v1644_v47 = vcvt.f32.s32 %v1643_v8  ;;  %v1707_v40 = vtrunc.f32 %v792_v22 }
 0x1c3   :  { %v1646_v49 = vcvt.f32.s32 %v1645_v27  ;;  %v1553_v41 = vcvt.f32.s32 %v2231_v34  ;;  %v1640_v52 = vcvt.f32.s32 %v1639_v26  ;;  %v1709_v54 = vtrunc.f32 %v793_v39 }
 0x1c4   :  { %v1641_v53 = vtrunc.f32 %v759_v43  ;;  %v727_v55 = vmax.f32 %v663_v45, 0.0  ;;  %v1703_v56 = vtrunc.f32 %v790_v36  ;;  %v1299_v57 = vand.u32 2147483647, %v1298_v37 }
 0x1c5   :  { %v1554_v58 = vcvt.s32.f32 %v1553_v41  ;;  %v2240_v50 = vadd.f32 %v2115_v13, %v466_v38  ;;  %v1295_v61 = vand.u32 2147483647, %v2223_v35  ;;  %v1281_v59 = vcvt.f32.s32 %v2236_v42 }
 0x1c6   :  { %v1642_v25 = vcvt.f32.s32 %v1641_v53  ;;  %v791_v10 = vmin.f32 %v727_v55, 255.0  ;;  %v1708_v29 = vcvt.f32.s32 %v1707_v40  ;;  %v882_v3 = vpack.c.b16 %v1646_v49, %v1644_v47  ;;  %v379_v40 = vpop.f32.mrf.mxu1 }
 0x1c7   :  { %v1300_v4 = vand.u32 2147483648, %v2223_v35  ;;  %v1710_v0 = vcvt.f32.s32 %v1709_v54  ;;  %v1282_v6 = vcvt.s32.f32 %v1281_v59  ;;  %v1704_v8 = vcvt.f32.s32 %v1703_v56 }
 0x1c8   :  { %v881_v5 = vpack.c.b16 %v1642_v25, %v1640_v52  ;;  %v1705_v1 = vtrunc.f32 %v791_v10  ;;  %v1555_v44 = vand.u32 2147483647, %v1554_v58  ;;  %v1537_v2 = vcvt.f32.s32 %v2240_v50 }
 0x1c9   :  { %v1301_v9 = vor.u32 %v1300_v4, %v1299_v57  ;;  %vm2246_vm0 = vcmp.lt.f32.partialorder %v1295_v61, 8388608.0  ;;  %v1283_v16 = vand.u32 2147483647, %v1282_v6  ;;  %v1551_v48 = vand.u32 2147483647, %v2231_v34 }
 0x1ca   :  { %v883_v46 = vpack.c.b8 %v882_v3, %v881_v5  ;;  %v1706_v11 = vcvt.f32.s32 %v1705_v1  ;;  %v1556_v51 = vand.u32 2147483648, %v2231_v34  ;;  %v1538_v17 = vcvt.s32.f32 %v1537_v2 }
 0x1cb   :  { %v437_v18 = vmul.f32 %v1034_v31, %v1856_v60  ;;  %v906_v19 = vpack.c.b16 %v1710_v0, %v1708_v29  ;;  %v1284_v21 = vand.u32 2147483648, %v2236_v42  ;;  %v469_v22 = vmul.f32 %v1066_v63, %v1856_v60  ;;  %v1037_v31 = vpop.f32.mrf.mxu0 }
 0x1cc   :  { %919 = vst [vmem:[#allocation9 + $0x28] sm:$0xff] %v883_v46  ;;  %v905_v20 = vpack.c.b16 %v1706_v11, %v1704_v8  ;;  %v1302_v62 = vsel %vm2246_vm0, %v1301_v9, %v2223_v35  ;;  %v1557_v24 = vor.u32 %v1556_v51, %v1555_v44  ;;  %v1279_v7 = vand.u32 2147483647, %v2236_v42 }
 0x1cd   :  { %v508_v26 = vadd.f32 %v2115_v13, %v437_v18  ;;  %v1285_v28 = vor.u32 %v1284_v21, %v1283_v16  ;;  %v1539_v30 = vand.u32 2147483647, %v1538_v17  ;;  %v540_v32 = vadd.f32 %v2115_v13, %v469_v22  ;;  %v1069_v16 = vpop.f32.mrf.mxu1 }
 0x1ce   :  { %v907_v27 = vpack.c.b8 %v906_v19, %v905_v20  ;;  %v435_v36 = vmul.f32 %v1856_v60, %v251_v23  ;;  %v636_v15 = vadd.f32 %v1302_v62, %v1869_v12  ;;  %vm2263_vm1 = vcmp.lt.f32.partialorder %v1551_v48, 8388608.0 }
 0x1cf   :  { %v1305_v33 = vcvt.f32.s32 %v508_v26  ;;  %v1540_v35 = vand.u32 2147483648, %v2240_v50  ;;  %v1561_v38 = vcvt.f32.s32 %v540_v32  ;;  %v1558_v39 = vsel %vm2263_vm1, %v1557_v24, %v2231_v34  ;;  %v264_v24 = vpop.f32.mrf.mxu0 }
 0x1d0   :  { %927 = vst [vmem:[#allocation9 + $0x68] sm:$0xff] %v907_v27  ;;  %vm2271_vm2 = vcmp.lt.f32.partialorder %v1279_v7, 8388608.0  ;;  %v1535_v45 = vand.u32 2147483647, %v2240_v50  ;;  %v1303_v52 = vand.u32 2147483647, %v508_v26  ;;  %v506_v34 = vadd.f32 %v2115_v13, %v435_v36 }
 0x1d1   :  { %v1306_v47 = vcvt.s32.f32 %v1305_v33  ;;  %v1286_v49 = vsel %vm2271_vm2, %v1285_v28, %v2236_v42  ;;  %v1541_v41 = vor.u32 %v1540_v35, %v1539_v30  ;;  %v1562_v54 = vcvt.s32.f32 %v1561_v38  ;;  %v392_v30 = vpop.f32.mrf.mxu1 }
 0x1d2   :  { %v1308_v55 = vand.u32 2147483648, %v508_v26  ;;  %v1559_v56 = vand.u32 2147483647, %v540_v32  ;;  %v700_v57 = vmax.f32 %v636_v15, 0.0  ;;  %v1564_v25 = vand.u32 2147483648, %v540_v32 }
 0x1d3   :  { %v1307_v53 = vand.u32 2147483647, %v1306_v47  ;;  %v1563_v58 = vand.u32 2147483647, %v1562_v54  ;;  %v467_v10 = vmul.f32 %v1856_v60, %v379_v40  ;;  %v668_v61 = vadd.f32 %v1558_v39, %v1869_v12 }
 0x1d4   :  { %vm2282_vm3 = vcmp.lt.f32.partialorder %v1535_v45, 8388608.0  ;;  %v1289_v29 = vcvt.f32.s32 %v506_v34  ;;  %v634_v3 = vadd.f32 %v1286_v49, %v1869_v12  ;;  %vm1304_vm4 = vcmp.lt.f32.partialorder %v1303_v52, 8388608.0 }
 0x1d5   :  { %v1309_v42 = vor.u32 %v1308_v55, %v1307_v53  ;;  %v1565_v4 = vor.u32 %v1564_v25, %v1563_v58  ;;  %v538_v0 = vadd.f32 %v2115_v13, %v467_v10  ;;  %v1542_v5 = vsel %vm2282_vm3, %v1541_v41, %v2240_v50 }
 0x1d6   :  { %vm1560_vm5 = vcmp.lt.f32.partialorder %v1559_v56, 8388608.0  ;;  %v1290_v6 = vcvt.s32.f32 %v1289_v29  ;;  %v764_v8 = vmin.f32 %v700_v57, 255.0  ;;  %v1287_v2 = vand.u32 2147483647, %v506_v34 }
 0x1d7   :  { %v1310_v1 = vsel %vm1304_vm4, %v1309_v42, %v508_v26  ;;  %v1566_v44 = vsel %vm1560_vm5, %v1565_v4, %v540_v32  ;;  %v1292_v11 = vand.u32 2147483648, %v506_v34  ;;  %v1545_v14 = vcvt.f32.s32 %v538_v0 }
 0x1d8   :  { %v637_v9 = vadd.f32 %v1310_v1, %v1869_v12  ;;  %v669_v63 = vadd.f32 %v1566_v44, %v1869_v12  ;;  %v1291_v46 = vand.u32 2147483647, %v1290_v6  ;;  %v698_v48 = vmax.f32 %v634_v3, 0.0 }
 0x1d9   :  { %v666_v51 = vadd.f32 %v1542_v5, %v1869_v12  ;;  %v440_v50 = vmul.f32 %v1037_v31, %v1856_v60  ;;  %v732_v18 = vmax.f32 %v668_v61, 0.0  ;;  %v1546_v21 = vcvt.s32.f32 %v1545_v14 }
 0x1da   :  { %v701_v17 = vmax.f32 %v637_v9, 0.0  ;;  %v733_v19 = vmax.f32 %v669_v63, 0.0  ;;  %v1293_v20 = vor.u32 %v1292_v11, %v1291_v46  ;;  %vm1288_vm6 = vcmp.lt.f32.partialorder %v1287_v2, 8388608.0  ;;  %v1038_v63 = vpop.f32.mrf.mxu0  ;;  %v1070_v46 = vpop.f32.mrf.mxu1 }
 0x1db   :  { %v1543_v23 = vand.u32 2147483647, %v538_v0  ;;  %v1548_v62 = vand.u32 2147483648, %v538_v0  ;;  %v1547_v26 = vand.u32 2147483647, %v1546_v21  ;;  %v2296_v27 = vadd.f32 %v2115_v13, %v440_v50 }
 0x1dc   :  { %v765_v22 = vmin.f32 %v701_v17, 255.0  ;;  %v1294_v7 = vsel %vm1288_vm6, %v1293_v20, %v506_v34  ;;  %v472_v28 = vmul.f32 %v1069_v16, %v1856_v60  ;;  %v762_v32 = vmin.f32 %v698_v48, 255.0 }
 0x1dd   :  { %v730_v33 = vmax.f32 %v666_v51, 0.0  ;;  %v635_v36 = vadd.f32 %v1294_v7, %v1869_v12  ;;  %v797_v37 = vmin.f32 %v733_v19, 255.0  ;;  %v1549_v35 = vor.u32 %v1548_v62, %v1547_v26  ;;  %v267_v7 = vpop.f32.mrf.mxu0 }
 0x1de   :  { %v1653_v15 = vtrunc.f32 %v765_v22  ;;  %v438_v38 = vmul.f32 %v1856_v60, %v264_v24  ;;  %v1651_v39 = vtrunc.f32 %v764_v8  ;;  %vm1544_vm7 = vcmp.lt.f32.partialorder %v1543_v23, 8388608.0 }
 0x1df   :  { %v699_v43 = vmax.f32 %v635_v36, 0.0  ;;  %v470_v45 = vmul.f32 %v1856_v60, %v392_v30  ;;  %v796_v47 = vmin.f32 %v732_v18, 255.0  ;;  %v1550_v40 = vsel %vm1544_vm7, %v1549_v35, %v538_v0 }
 0x1e0   :  { %v1329_v49 = vcvt.f32.s32 %v2296_v27  ;;  %v2304_v41 = vadd.f32 %v2115_v13, %v472_v28  ;;  %v1647_v52 = vtrunc.f32 %v762_v32  ;;  %v794_v54 = vmin.f32 %v730_v33, 255.0 }
 0x1e1   :  { %v763_v53 = vmin.f32 %v699_v43, 255.0  ;;  %v667_v55 = vadd.f32 %v1550_v40, %v1869_v12  ;;  %v1654_v56 = vcvt.f32.s32 %v1653_v15  ;;  %v1717_v34 = vtrunc.f32 %v797_v37 }
 0x1e2   :  { %v2308_v57 = vadd.f32 %v2115_v13, %v438_v38  ;;  %v1652_v58 = vcvt.f32.s32 %v1651_v39  ;;  %v2311_v61 = vadd.f32 %v2115_v13, %v470_v45  ;;  %v1715_v59 = vtrunc.f32 %v796_v47 }
 0x1e3   :  { %v1649_v25 = vtrunc.f32 %v763_v53  ;;  %v731_v10 = vmax.f32 %v667_v55, 0.0  ;;  %v1330_v42 = vcvt.s32.f32 %v1329_v49  ;;  %v1585_v29 = vcvt.f32.s32 %v2304_v41  ;;  %v395_v55 = vpop.f32.mrf.mxu1 }
 0x1e4   :  { %v1313_v3 = vcvt.f32.s32 %v2308_v57  ;;  %v1648_v4 = vcvt.f32.s32 %v1647_v52  ;;  %v1711_v0 = vtrunc.f32 %v794_v54  ;;  %v885_v6 = vpack.c.b16 %v1654_v56, %v1652_v58 }
 0x1e5   :  { %v1650_v5 = vcvt.f32.s32 %v1649_v25  ;;  %v795_v1 = vmin.f32 %v731_v10, 255.0  ;;  %v1718_v31 = vcvt.f32.s32 %v1717_v34  ;;  %v1569_v2 = vcvt.f32.s32 %v2311_v61 }
 0x1e6   :  { %v1314_v44 = vcvt.s32.f32 %v1313_v3  ;;  %v1716_v11 = vcvt.f32.s32 %v1715_v59  ;;  %v1331_v14 = vand.u32 2147483647, %v1330_v42  ;;  %v1586_v16 = vcvt.s32.f32 %v1585_v29 }
 0x1e7   :  { %v884_v8 = vpack.c.b16 %v1650_v5, %v1648_v4  ;;  %v1713_v9 = vtrunc.f32 %v795_v1  ;;  %v1712_v48 = vcvt.f32.s32 %v1711_v0  ;;  %v1570_v50 = vcvt.s32.f32 %v1569_v2 }
 0x1e8   :  { %v1327_v18 = vand.u32 2147483647, %v2296_v27  ;;  %v1332_v19 = vand.u32 2147483648, %v2296_v27  ;;  %v441_v20 = vmul.f32 %v1038_v63, %v1856_v60  ;;  %v473_v21 = vmul.f32 %v1070_v46, %v1856_v60 }
 0x1e9   :  { %v886_v51 = vpack.c.b8 %v885_v6, %v884_v8  ;;  %v1714_v17 = vcvt.f32.s32 %v1713_v9  ;;  %v909_v22 = vpack.c.b16 %v1718_v31, %v1716_v11  ;;  %v1583_v62 = vand.u32 2147483647, %v2304_v41 }
 0x1ea   :  { %v1315_v24 = vand.u32 2147483647, %v1314_v44  ;;  %v1333_v26 = vor.u32 %v1332_v19, %v1331_v14  ;;  %v1587_v28 = vand.u32 2147483647, %v1586_v16  ;;  %v512_v30 = vadd.f32 %v2115_v13, %v441_v20 }
 0x1eb   :  { %920 = vst [vmem:[#allocation9 + $0x30] sm:$0xff] %v886_v51  ;;  %v908_v23 = vpack.c.b16 %v1714_v17, %v1712_v48  ;;  %v544_v32 = vadd.f32 %v2115_v13, %v473_v21  ;;  %v1311_v36 = vand.u32 2147483647, %v2308_v57  ;;  %v1316_v15 = vand.u32 2147483648, %v2308_v57 }
 0x1ec   :  { %v1571_v37 = vand.u32 2147483647, %v1570_v50  ;;  %v1588_v35 = vand.u32 2147483648, %v2304_v41  ;;  %v1337_v38 = vcvt.f32.s32 %v512_v30  ;;  %v439_v39 = vmul.f32 %v1856_v60, %v267_v7 }
 0x1ed   :  { %v910_v33 = vpack.c.b8 %v909_v22, %v908_v23  ;;  %vm2327_vm8 = vcmp.lt.f32.partialorder %v1327_v18, 8388608.0  ;;  %v1317_v45 = vor.u32 %v1316_v15, %v1315_v24  ;;  %v1567_v47 = vand.u32 2147483647, %v2311_v61 }
 0x1ee   :  { %v1572_v40 = vand.u32 2147483648, %v2311_v61  ;;  %vm2333_vm9 = vcmp.lt.f32.partialorder %v1583_v62, 8388608.0  ;;  %v1589_v52 = vor.u32 %v1588_v35, %v1587_v28  ;;  %v1338_v54 = vcvt.s32.f32 %v1337_v38 }
 0x1ef   :  { %928 = vst [vmem:[#allocation9 + $0x70] sm:$0xff] %v910_v33  ;;  %v1593_v53 = vcvt.f32.s32 %v544_v32  ;;  %v1334_v56 = vsel %vm2327_vm8, %v1333_v26, %v2296_v27  ;;  %vm2340_vm10 = vcmp.lt.f32.partialorder %v1311_v36, 8388608.0  ;;  %v1335_v25 = vand.u32 2147483647, %v512_v30 }
 0x1f0   :  { %v1573_v58 = vor.u32 %v1572_v40, %v1571_v37  ;;  %v1339_v10 = vand.u32 2147483647, %v1338_v54  ;;  %v1340_v59 = vand.u32 2147483648, %v512_v30  ;;  %v510_v29 = vadd.f32 %v2115_v13, %v439_v39 }
 0x1f1   :  { %v1594_v42 = vcvt.s32.f32 %v1593_v53  ;;  %v1318_v3 = vsel %vm2340_vm10, %v1317_v45, %v2308_v57  ;;  %vm2348_vm11 = vcmp.lt.f32.partialorder %v1567_v47, 8388608.0  ;;  %v1591_v27 = vand.u32 2147483647, %v544_v32 }
 0x1f2   :  { %v471_v0 = vmul.f32 %v1856_v60, %v395_v55  ;;  %v1590_v5 = vsel %vm2333_vm9, %v1589_v52, %v2304_v41  ;;  %v1341_v1 = vor.u32 %v1340_v59, %v1339_v10  ;;  %v1596_v31 = vand.u32 2147483648, %v544_v32 }
 0x1f3   :  { %v1595_v6 = vand.u32 2147483647, %v1594_v42  ;;  %v1574_v8 = vsel %vm2348_vm11, %v1573_v58, %v2311_v61  ;;  %vm1336_vm12 = vcmp.lt.f32.partialorder %v1335_v25, 8388608.0  ;;  %v1321_v57 = vcvt.f32.s32 %v510_v29 }
 0x1f4   :  { %v542_v9 = vadd.f32 %v2115_v13, %v471_v0  ;;  %v640_v44 = vadd.f32 %v1334_v56, %v1869_v12  ;;  %v638_v2 = vadd.f32 %v1318_v3, %v1869_v12  ;;  %v1342_v60 = vsel %vm1336_vm12, %v1341_v1, %v512_v30 }
 0x1f5   :  { %v1597_v63 = vor.u32 %v1596_v31, %v1595_v6  ;;  %v641_v46 = vadd.f32 %v1342_v60, %v1869_v12  ;;  %vm1592_vm13 = vcmp.lt.f32.partialorder %v1591_v27, 8388608.0  ;;  %v1322_v41 = vcvt.s32.f32 %v1321_v57 }
 0x1f6   :  { %v1577_v11 = vcvt.f32.s32 %v542_v9  ;;  %v672_v14 = vadd.f32 %v1590_v5, %v1869_v12  ;;  %v670_v16 = vadd.f32 %v1574_v8, %v1869_v12  ;;  %v1319_v48 = vand.u32 2147483647, %v510_v29 }
 0x1f7   :  { %v1598_v61 = vsel %vm1592_vm13, %v1597_v63, %v544_v32  ;;  %v705_v51 = vmax.f32 %v641_v46, 0.0  ;;  %v1323_v17 = vand.u32 2147483647, %v1322_v41  ;;  %v1324_v50 = vand.u32 2147483648, %v510_v29 }
 0x1f8   :  { %v673_v13 = vadd.f32 %v1598_v61, %v1869_v12  ;;  %v704_v18 = vmax.f32 %v640_v44, 0.0  ;;  %v702_v19 = vmax.f32 %v638_v2, 0.0  ;;  %v1578_v20 = vcvt.s32.f32 %v1577_v11 }
 0x1f9   :  { %v1325_v22 = vor.u32 %v1324_v50, %v1323_v17  ;;  %v1575_v23 = vand.u32 2147483647, %v542_v9  ;;  %v769_v62 = vmin.f32 %v705_v51, 255.0  ;;  %vm1320_vm14 = vcmp.lt.f32.partialorder %v1319_v48, 8388608.0 }
 0x1fa   :  { %v737_v21 = vmax.f32 %v673_v13, 0.0  ;;  %v1579_v24 = vand.u32 2147483647, %v1578_v20  ;;  %v1580_v7 = vand.u32 2147483648, %v542_v9  ;;  %v736_v26 = vmax.f32 %v672_v14, 0.0 }
 0x1fb   :  { %v734_v28 = vmax.f32 %v670_v16, 0.0  ;;  %v1326_v30 = vsel %vm1320_vm14, %v1325_v22, %v510_v29  ;;  %v768_v32 = vmin.f32 %v704_v18, 255.0  ;;  %v766_v33 = vmin.f32 %v702_v19, 255.0 }
 0x1fc   :  { %v639_v36 = vadd.f32 %v1326_v30, %v1869_v12  ;;  %v1581_v15 = vor.u32 %v1580_v7, %v1579_v24  ;;  %v801_v37 = vmin.f32 %v737_v21, 255.0  ;;  %vm1576_vm15 = vcmp.lt.f32.partialorder %v1575_v23, 8388608.0 }
 0x1fd   :  { %v1661_v35 = vtrunc.f32 %v769_v62  ;;  %v800_v43 = vmin.f32 %v736_v26, 255.0  ;;  %v798_v45 = vmin.f32 %v734_v28, 255.0  ;;  %v1659_v40 = vtrunc.f32 %v768_v32 }
 0x1fe   :  { %v703_v38 = vmax.f32 %v639_v36, 0.0  ;;  %v1582_v39 = vsel %vm1576_vm15, %v1581_v15, %v542_v9  ;;  %v1655_v49 = vtrunc.f32 %v766_v33  ;;  %v1725_v54 = vtrunc.f32 %v801_v37 }
 0x1ff   :  { %v671_v47 = vadd.f32 %v1582_v39, %v1869_v12  ;;  %v1662_v55 = vcvt.f32.s32 %v1661_v35  ;;  %v1723_v34 = vtrunc.f32 %v800_v43  ;;  %v1719_v58 = vtrunc.f32 %v798_v45 }
 0x200   :  { %v767_v52 = vmin.f32 %v703_v38, 255.0  ;;  %v1660_v10 = vcvt.f32.s32 %v1659_v40  ;;  %v1656_v59 = vcvt.f32.s32 %v1655_v49  ;;  %v1726_v29 = vcvt.f32.s32 %v1725_v54 }
 0x201   :  { %v735_v53 = vmax.f32 %v671_v47, 0.0  ;;  %v1724_v0 = vcvt.f32.s32 %v1723_v34  ;;  %v1720_v5 = vcvt.f32.s32 %v1719_v58 }
 0x202   :  { %v1657_v56 = vtrunc.f32 %v767_v52  ;;  %v888_v4 = vpack.c.b16 %v1662_v55, %v1660_v10 }
 0x203   :  { %v799_v25 = vmin.f32 %v735_v53, 255.0  ;;  %v912_v6 = vpack.c.b16 %v1726_v29, %v1724_v0 }
 0x204   :  { %v1658_v42 = vcvt.f32.s32 %v1657_v56 }
 0x205   :  { %v1721_v3 = vtrunc.f32 %v799_v25 }
 0x206   :  { %v887_v27 = vpack.c.b16 %v1658_v42, %v1656_v59 }
 0x207   :  { %v1722_v12 = vcvt.f32.s32 %v1721_v3 }
 0x208   :  { %v889_v1 = vpack.c.b8 %v888_v4, %v887_v27 }
 0x209   :  { %v911_v31 = vpack.c.b16 %v1722_v12, %v1720_v5 }
 0x20a   :  { %921 = vst [vmem:[#allocation9 + $0x38] sm:$0xff] %v889_v1 }
 0x20b   :  { %v913_v8 = vpack.c.b8 %v912_v6, %v911_v31 }
 0x20d   :  { %929 = vst [vmem:[#allocation9 + $0x78] sm:$0xff] %v913_v8 }
 0x20e   :  { %1793 = shalt.err (!%p1790_p0)
}
 0x20f   :  { %941 = dma.vmem_to_hbm [thread:$0]  %s936_s7, 2048, %s2378_s4, [#allocation4], %s1812_s21, %s1812_s21, %s1813_s22  }
 0x210   :  { %1808 = dma.done.wait [#allocation4], 2048  }
 0x211   :  { %1809 = vsyncadd [#allocation4], 4294965248 }
 0x212   :  { %945 = vsyncpa [#allocation3], 1 }
 0x213   :  { %946 = vsyncpa [#allocation8], 1 }
 0x214   :  { %947 = vsyncpa [#allocation4], 1 }
 0x215   :  { %948 = vsyncpa [#allocation5], 1 }

</bundles_post_ra>
